<compile_context>
chip_gen: v7x
topology: tpu7x:2x2x1
jax: 0.10.0
libtpu: 0.0.40
codegen_flags: <defaults>
</compile_context>

<pallas_src>
import functools

import jax
import jax.numpy as jnp
from jax.experimental import pallas as pl
from jax.experimental.pallas import tpu as pltpu

LANE = 128
# Conservative so a resident-weight plan (incl. x2 pipeline buffers) still
# leaves room for activation buffers inside v7x's 64 MiB physical VMEM.
_RESIDENT_WEIGHT_BUDGET = 24 * 1024 * 1024


def _pad_up(n, m=LANE):
    return ((n + m - 1) // m) * m


def _pad_last2(a, rows, cols):
    pads = [(0, 0)] * (a.ndim - 2) + [(0, rows - a.shape[-2]),
                                      (0, cols - a.shape[-1])]
    return jnp.pad(a, pads)


# ---------------------------------------------------------------------------
# Pallas kernel: one batch tile x one residual layer per grid step.
# Grid = (batch_tiles [parallel], n_layers [arbitrary]).
# Weights arrive either as per-layer slabs (streamed) or as the full (L, ...)
# stack resident in VMEM (indexed with pl.program_id(1)).
# ---------------------------------------------------------------------------
def resnet_kernel(x_ref, emb_ref,
                  wx_ref, bx_ref,
                  w01_ref, b01_ref,
                  w2_ref, b2_ref,
                  w3_ref, b3_ref,
                  wl_ref, bl_ref,
                  o_ref,
                  h_acc, cat_acc,
                  *, h_dim, h_pad, resident, eps=1e-5):
    layer = pl.program_id(1)
    n_layers = pl.num_programs(1)

    def w(ref):
        # resident: (L, ...) stack in VMEM -> pick this layer's slab
        # streamed: Pallas already delivered this layer's (squeezed) slab
        return ref[layer] if resident else ref[...]

    # --- init (once per batch tile): h = layer_x(x); emb half of cat scratch -
    @pl.when(layer == 0)
    def _():
        h_acc[...] = (jnp.dot(x_ref[...], wx_ref[...],
                              preferred_element_type=jnp.float32)
                      + bx_ref[...])
        cat_acc[:, h_pad:] = emb_ref[...]          # bf16, written once per tile

    h = h_acc[...]                                 # (bm, h_pad) f32

    # --- layer_norm over the real h_dim features (two-pass, padded cols of h
    #     are exactly zero; padded lanes of (h - mu) are masked off) ---------
    inv_n = 1.0 / h_dim
    mu = jnp.sum(h, axis=-1, keepdims=True) * inv_n
    d = h - mu
    if h_pad != h_dim:
        col = jax.lax.broadcasted_iota(jnp.int32, d.shape, 1)
        d = jnp.where(col < h_dim, d, 0.0)
    var = jnp.sum(d * d, axis=-1, keepdims=True) * inv_n
    hn = d * jax.lax.rsqrt(var + eps)
    hn = hn * jax.nn.sigmoid(hn)                   # silu; padded lanes stay 0

    # --- fused layer[0](hn) + layer[1](emb): [hn | emb] @ [w0 ; w1] + (b0+b1) -
    # only the hn half of the persistent cat scratch is rewritten per layer.
    cat_acc[:, :h_pad] = hn.astype(jnp.bfloat16)
    z = jnp.dot(cat_acc[...], w(w01_ref),
                preferred_element_type=jnp.float32) + w(b01_ref)
    z = z * jax.nn.sigmoid(z)                      # silu

    # --- layer[2] ---
    z = jnp.dot(z.astype(jnp.bfloat16), w(w2_ref),
                preferred_element_type=jnp.float32) + w(b2_ref)

    # --- residual: h = h + layer[3](z) ---
    h = h + jnp.dot(z.astype(jnp.bfloat16), w(w3_ref),
                    preferred_element_type=jnp.float32) + w(b3_ref)
    h_acc[...] = h

    # --- finalize: last_layer ---
    @pl.when(layer == n_layers - 1)
    def _():
        o_ref[...] = (jnp.dot(h.astype(jnp.bfloat16), wl_ref[...],
                              preferred_element_type=jnp.float32)
                      + bl_ref[...])


# ---------------------------------------------------------------------------
# Parameters (weights stored as (in, out); biases as (1, out) / (L, 1, out)).
# ---------------------------------------------------------------------------
def make_params(key, n_steps, n_layers, x_dim, h_dim, emb_dim, widen,
                zero_init_like_torch=False):
    hw = h_dim * widen
    ks = jax.random.split(key, 16)
    u = lambda k, shape, s=0.1: jax.random.uniform(k, shape, jnp.float32, -s, s)
    # NOTE: PyTorch zero-inits layers[i][-1].weight and last_layer.weight; the
    # kernel must handle arbitrary (trained) values, so the test uses non-zero
    # weights unless zero_init_like_torch=True.
    w3 = (jnp.zeros((n_layers, hw, h_dim), jnp.float32)
          if zero_init_like_torch else u(ks[11], (n_layers, hw, h_dim)))
    wl = (jnp.zeros((h_dim, x_dim), jnp.float32)
          if zero_init_like_torch else u(ks[12], (h_dim, x_dim)))
    return dict(
        emb_table=u(ks[0], (n_steps, emb_dim), 1.0),
        wx=u(ks[1], (x_dim, h_dim)),  bx=u(ks[2], (1, h_dim)),
        w0=u(ks[3], (n_layers, h_dim, hw)),   b0=u(ks[4], (n_layers, 1, hw)),
        w1=u(ks[5], (n_layers, emb_dim, hw)), b1=u(ks[6], (n_layers, 1, hw)),
        w2=u(ks[7], (n_layers, hw, hw)),      b2=u(ks[8], (n_layers, 1, hw)),
        w3=w3,                                b3=u(ks[9], (n_layers, 1, h_dim)),
        wl=wl,                                bl=u(ks[10], (1, x_dim)),
    )


# ---------------------------------------------------------------------------
# Wrapper: padding / weight packing glue + pallas_call.
# ---------------------------------------------------------------------------
@functools.partial(jax.jit, static_argnames=("bm", "mode"))
def resnet_forward(x, t, params, *, bm=None, mode="auto"):
    x = jnp.atleast_2d(x).astype(jnp.float32)
    t = jnp.atleast_1d(t)
    emb = params["emb_table"][t].astype(jnp.float32)   # embedding gather (glue)

    B, x_dim = x.shape
    h_dim = params["wx"].shape[1]
    emb_dim = params["emb_table"].shape[1]
    n_layers, _, hw = params["w0"].shape

    xdp, hdp, edp, hwp = (_pad_up(d) for d in (x_dim, h_dim, emb_dim, hw))
    wdt = jnp.bfloat16                                  # weight storage dtype

    # Batch tile: 256 fills the v6e/v7x 256-wide MXU; keep >=2 tiles when the
    # batch allows it so the "parallel" axis feeds both v7x TensorCores.
    if bm is None:
        bm = 256 if B >= 512 else 128
    Bp = ((B + bm - 1) // bm) * bm

    # Zero-padded, packed weights. Weights -> bf16, biases stay f32.
    wx = _pad_last2(params["wx"], xdp, hdp).astype(wdt)
    bx = _pad_last2(params["bx"], 1, hdp)
    w01 = jnp.concatenate([_pad_last2(params["w0"], hdp, hwp),
                           _pad_last2(params["w1"], edp, hwp)],
                          axis=1).astype(wdt)           # (L, hdp+edp, hwp)
    b01 = _pad_last2(params["b0"] + params["b1"], 1, hwp)
    w2 = _pad_last2(params["w2"], hwp, hwp).astype(wdt)
    b2 = _pad_last2(params["b2"], 1, hwp)
    w3 = _pad_last2(params["w3"], hwp, hdp).astype(wdt)
    b3 = _pad_last2(params["b3"], 1, hdp)
    wl = _pad_last2(params["wl"], hdp, xdp).astype(wdt)
    bl = _pad_last2(params["bl"], 1, xdp)

    # Activations padded + cast to bf16 (halves DMA bytes; accum stays f32).
    xp = jnp.zeros((Bp, xdp), jnp.bfloat16).at[:B, :x_dim].set(
        x.astype(jnp.bfloat16))
    embp = jnp.zeros((Bp, edp), jnp.bfloat16).at[:B, :emb_dim].set(
        emb.astype(jnp.bfloat16))

    # ---- weight residency decision (static, shape-derived Python ints) -----
    layer_w_bytes = 2 * ((hdp + edp) * hwp + hwp * hwp + hwp * hdp)
    layer_b_bytes = 4 * (2 * hwp + hdp)
    edge_bytes = 2 * (xdp * hdp + hdp * xdp) + 4 * (hdp + xdp)
    resident_bytes = 2 * (n_layers * (layer_w_bytes + layer_b_bytes)
                          + edge_bytes)                 # x2: pipeline buffers
    if mode == "auto":
        resident = resident_bytes <= _RESIDENT_WEIGHT_BUDGET
    else:
        resident = (mode == "resident")

    if resident:
        live_weight_bytes = resident_bytes
    else:
        live_weight_bytes = 2 * (layer_w_bytes + layer_b_bytes) + 2 * edge_bytes
    act_bytes = 2 * bm * (2 * (xdp + edp) + 4 * xdp)    # double-buffered tiles
    scratch_bytes = bm * (4 * hdp + 2 * (hdp + edp))
    vmem_limit = int(min(100 * 2**20,
                         max(32 * 2**20,
                             live_weight_bytes + act_bytes + scratch_bytes
                             + 4 * 2**20)))

    def rep2(shape):                                    # replicated 2-D block
        return pl.BlockSpec(shape, lambda i, l: (0, 0))

    def per_layer(shape):                               # one layer's slab
        return pl.BlockSpec((None,) + shape, lambda i, l: (l, 0, 0))

    def resident_all(shape):                            # full (L, ...) stack
        return pl.BlockSpec((n_layers,) + shape, lambda i, l: (0, 0, 0))

    # TODO(synk): if weights stay streamed on v5e, pipeline_mode=pl.Buffered(3)
    # on the w01/w2/w3 specs hides the w2 DMA behind the short per-layer compute.
    wspec = resident_all if resident else per_layer

    in_specs = [
        pl.BlockSpec((bm, xdp), lambda i, l: (i, 0)),
        pl.BlockSpec((bm, edp), lambda i, l: (i, 0)),
        rep2((xdp, hdp)), rep2((1, hdp)),
        wspec((hdp + edp, hwp)), wspec((1, hwp)),
        wspec((hwp, hwp)),       wspec((1, hwp)),
        wspec((hwp, hdp)),       wspec((1, hdp)),
        rep2((hdp, xdp)), rep2((1, xdp)),
    ]
    out_specs = pl.BlockSpec((bm, xdp), lambda i, l: (i, 0))

    out_padded = pl.pallas_call(
        functools.partial(resnet_kernel, h_dim=h_dim, h_pad=hdp,
                          resident=resident),
        out_shape=jax.ShapeDtypeStruct((Bp, xdp), jnp.float32),
        grid_spec=pltpu.PrefetchScalarGridSpec(
            num_scalar_prefetch=0,
            grid=(Bp // bm, n_layers),
            in_specs=in_specs,
            out_specs=out_specs,
            scratch_shapes=[
                pltpu.VMEM((bm, hdp), jnp.float32),           # running h
                pltpu.VMEM((bm, hdp + edp), jnp.bfloat16),    # [hn | emb]
            ],
        ),
        compiler_params=pltpu.CompilerParams(
            dimension_semantics=("parallel", "arbitrary"),
            vmem_limit_bytes=vmem_limit,
        ),
    )(xp, embp, wx, bx, w01, b01, w2, b2, w3, b3, wl, bl)

    return out_padded[:B, :x_dim]


# ---------------------------------------------------------------------------
# Pure-JAX f32 reference (mirrors the PyTorch forward).
# ---------------------------------------------------------------------------
def resnet_reference(x, t, params):
    x = jnp.atleast_2d(x).astype(jnp.float32)
    t = jnp.atleast_1d(t)
    emb = params["emb_table"][t]
    h = x @ params["wx"] + params["bx"]
    n_layers = params["w0"].shape[0]
    for l in range(n_layers):
        mu = jnp.mean(h, axis=-1, keepdims=True)
        var = jnp.mean((h - mu) ** 2, axis=-1, keepdims=True)
        hn = (h - mu) / jnp.sqrt(var + 1e-5)
        hn = jax.nn.silu(hn)
        z = hn @ params["w0"][l] + params["b0"][l]
        z = z + emb @ params["w1"][l] + params["b1"][l]
        z = jax.nn.silu(z)
        z = z @ params["w2"][l] + params["b2"][l]
        h = h + z @ params["w3"][l] + params["b3"][l]
    return h @ params["wl"] + params["bl"]


if __name__ == "__main__":
    # Small model dims consistent with the module; batch gives 2 parallel tiles.
    n_steps, n_layers = 10, 2
    x_dim, h_dim, emb_dim, widen = 8, 32, 16, 2
    batch = 256

    key = jax.random.PRNGKey(0)
    k_par, k_x, k_t = jax.random.split(key, 3)

    params = make_params(k_par, n_steps, n_layers, x_dim, h_dim, emb_dim, widen)
    x = jax.random.normal(k_x, (batch, x_dim), jnp.float32)
    t = jax.random.randint(k_t, (batch,), 0, n_steps, jnp.int32)

    ref = resnet_reference(x, t, params)

    # Auto mode -> VMEM-resident weights for this small config.
    out = jax.block_until_ready(resnet_forward(x, t, params))
    assert out.shape == (batch, x_dim)
    max_err = float(jnp.max(jnp.abs(out - ref)))
    # bf16 weights/activations (f32 accumulation) vs pure-f32 reference.
    assert max_err < 3e-2, f"resident-mode max abs err {max_err}"

    # Also exercise the streamed-weights fallback path (used when the full
    # weight stack would not fit the VMEM budget).
    out_s = jax.block_until_ready(resnet_forward(x, t, params, mode="streamed"))
    max_err_s = float(jnp.max(jnp.abs(out_s - ref)))
    assert max_err_s < 3e-2, f"streamed-mode max abs err {max_err_s}"

    print("KERNEL_OK")
</pallas_src>

<mosaic_0001>
module attributes {stable_mosaic.version = 11 : i64} {
  func.func @resnet_kernel(%arg0: i32, %arg1: i32, %arg2: memref<128x128xbf16, #tpu.memory_space<vmem>>, %arg3: memref<128x128xbf16, #tpu.memory_space<vmem>>, %arg4: memref<128x128xbf16, #tpu.memory_space<vmem>>, %arg5: memref<1x128xf32, #tpu.memory_space<vmem>>, %arg6: memref<2x256x128xbf16, #tpu.memory_space<vmem>>, %arg7: memref<2x1x128xf32, #tpu.memory_space<vmem>>, %arg8: memref<2x128x128xbf16, #tpu.memory_space<vmem>>, %arg9: memref<2x1x128xf32, #tpu.memory_space<vmem>>, %arg10: memref<2x128x128xbf16, #tpu.memory_space<vmem>>, %arg11: memref<2x1x128xf32, #tpu.memory_space<vmem>>, %arg12: memref<128x128xbf16, #tpu.memory_space<vmem>>, %arg13: memref<1x128xf32, #tpu.memory_space<vmem>>, %arg14: memref<128x128xf32, #tpu.memory_space<vmem>>, %arg15: memref<128x128xf32, #tpu.memory_space<vmem>>, %arg16: memref<128x256xbf16, #tpu.memory_space<vmem>>) attributes {dimension_semantics = [#tpu.dimension_semantics<parallel>, #tpu.dimension_semantics<arbitrary>], iteration_bounds = array<i64: 2, 2>, scalar_prefetch = 0 : i64, scratch_operands = 2 : i64, tpu.core_type = #tpu.core_type<tc>, window_params = [{transform_indices = @transform_0, window_bounds = array<i64: 128, 128>}, {transform_indices = @transform_1, window_bounds = array<i64: 128, 128>}, {pipeline_mode = #tpu.pipeline_mode<synchronous>, transform_indices = @transform_2, window_bounds = array<i64: 128, 128>}, {pipeline_mode = #tpu.pipeline_mode<synchronous>, transform_indices = @transform_3, window_bounds = array<i64: 1, 128>}, {pipeline_mode = #tpu.pipeline_mode<synchronous>, transform_indices = @transform_4, window_bounds = array<i64: 2, 256, 128>}, {pipeline_mode = #tpu.pipeline_mode<synchronous>, transform_indices = @transform_5, window_bounds = array<i64: 2, 1, 128>}, {pipeline_mode = #tpu.pipeline_mode<synchronous>, transform_indices = @transform_6, window_bounds = array<i64: 2, 128, 128>}, {pipeline_mode = #tpu.pipeline_mode<synchronous>, transform_indices = @transform_7, window_bounds = array<i64: 2, 1, 128>}, {pipeline_mode = #tpu.pipeline_mode<synchronous>, transform_indices = @transform_8, window_bounds = array<i64: 2, 128, 128>}, {pipeline_mode = #tpu.pipeline_mode<synchronous>, transform_indices = @transform_9, window_bounds = array<i64: 2, 1, 128>}, {pipeline_mode = #tpu.pipeline_mode<synchronous>, transform_indices = @transform_10, window_bounds = array<i64: 128, 128>}, {pipeline_mode = #tpu.pipeline_mode<synchronous>, transform_indices = @transform_11, window_bounds = array<i64: 1, 128>}, {transform_indices = @transform_12, window_bounds = array<i64: 128, 128>}]} {
    %c0_i32 = arith.constant 0 : i32
    %0 = arith.cmpi eq, %arg1, %c0_i32 : i32
    %1 = arith.extui %0 : i1 to i32
    %c0_i32_0 = arith.constant 0 : i32
    %2 = arith.cmpi ne, %1, %c0_i32_0 : i32
    scf.if %2 {
      %c0_31 = arith.constant 0 : index
      %c0_32 = arith.constant 0 : index
      %74 = vector.load %arg2[%c0_31, %c0_32] : memref<128x128xbf16, #tpu.memory_space<vmem>>, vector<128x128xbf16>
      %c0_33 = arith.constant 0 : index
      %c0_34 = arith.constant 0 : index
      %75 = vector.load %arg4[%c0_33, %c0_34] : memref<128x128xbf16, #tpu.memory_space<vmem>>, vector<128x128xbf16>
      %cst_35 = arith.constant dense<0.000000e+00> : vector<128x128xf32>
      %76 = tpu.matmul %74, %75, %cst_35 {dimension_numbers = #tpu.dot_dimension_numbers<[1], [0], [0], [1], [0, 0, 1, 1], [], []>} : vector<128x128xbf16>, vector<128x128xbf16>, vector<128x128xf32> -> vector<128x128xf32>
      %c0_36 = arith.constant 0 : index
      %c0_37 = arith.constant 0 : index
      %77 = vector.load %arg5[%c0_36, %c0_37] : memref<1x128xf32, #tpu.memory_space<vmem>>, vector<1x128xf32>
      %78 = vector.broadcast %77 : vector<1x128xf32> to vector<128x128xf32>
      %79 = arith.addf %76, %78 : vector<128x128xf32>
      %c0_38 = arith.constant 0 : index
      %c0_39 = arith.constant 0 : index
      %80 = vector.load %arg15[%c0_38, %c0_39] : memref<128x128xf32, #tpu.memory_space<vmem>>, vector<128x128xf32>
      tpu.vector_store %arg15[%c0_38, %c0_39], %79 {strides = array<i32>} : memref<128x128xf32, #tpu.memory_space<vmem>>, vector<128x128xf32>,
      %c0_40 = arith.constant 0 : index
      %c0_41 = arith.constant 0 : index
      %81 = vector.load %arg3[%c0_40, %c0_41] : memref<128x128xbf16, #tpu.memory_space<vmem>>, vector<128x128xbf16>
      %c0_42 = arith.constant 0 : index
      %c128 = arith.constant 128 : index
      %82 = vector.load %arg16[%c0_42, %c128] : memref<128x256xbf16, #tpu.memory_space<vmem>>, vector<128x128xbf16>
      tpu.vector_store %arg16[%c0_42, %c128], %81 {strides = array<i32>} : memref<128x256xbf16, #tpu.memory_space<vmem>>, vector<128x128xbf16>,
    } else {
    }
    %c0 = arith.constant 0 : index
    %c0_1 = arith.constant 0 : index
    %3 = vector.load %arg15[%c0, %c0_1] : memref<128x128xf32, #tpu.memory_space<vmem>>, vector<128x128xf32>
    %cst = arith.constant dense<0.000000e+00> : vector<128xf32>
    %4 = vector.multi_reduction <add>, %3, %cst [1] : vector<128x128xf32> to vector<128xf32>
    %5 = vector.shape_cast %4 : vector<128xf32> to vector<128x1xf32>
    %cst_2 = arith.constant 3.125000e-02 : f32
    %6 = vector.broadcast %cst_2 : f32 to vector<128x1xf32>
    %7 = arith.mulf %5, %6 : vector<128x1xf32>
    %8 = vector.broadcast %7 : vector<128x1xf32> to vector<128x128xf32>
    %9 = arith.subf %3, %8 : vector<128x128xf32>
    %10 = tpu.iota {dimensions = array<i32: 1>} : vector<128x128xi32>
    %c32_i32 = arith.constant 32 : i32
    %11 = vector.broadcast %c32_i32 : i32 to vector<128x128xi32>
    %12 = arith.cmpi slt, %10, %11 : vector<128x128xi32>
    %cst_3 = arith.constant 0.000000e+00 : f32
    %13 = vector.broadcast %cst_3 : f32 to vector<128x128xf32>
    %14 = arith.select %12, %9, %13 : vector<128x128xi1>, vector<128x128xf32>
    %15 = arith.mulf %14, %14 : vector<128x128xf32>
    %cst_4 = arith.constant dense<0.000000e+00> : vector<128xf32>
    %16 = vector.multi_reduction <add>, %15, %cst_4 [1] : vector<128x128xf32> to vector<128xf32>
    %17 = vector.shape_cast %16 : vector<128xf32> to vector<128x1xf32>
    %cst_5 = arith.constant 3.125000e-02 : f32
    %18 = vector.broadcast %cst_5 : f32 to vector<128x1xf32>
    %19 = arith.mulf %17, %18 : vector<128x1xf32>
    %cst_6 = arith.constant 9.99999974E-6 : f32
    %20 = vector.broadcast %cst_6 : f32 to vector<128x1xf32>
    %21 = arith.addf %19, %20 : vector<128x1xf32>
    %22 = math.rsqrt %21 : vector<128x1xf32>
    %23 = vector.broadcast %22 : vector<128x1xf32> to vector<128x128xf32>
    %24 = arith.mulf %14, %23 : vector<128x128xf32>
    %25 = arith.negf %24 : vector<128x128xf32>
    %26 = math.exp %25 : vector<128x128xf32>
    %cst_7 = arith.constant 1.000000e+00 : f32
    %27 = vector.broadcast %cst_7 : f32 to vector<128x128xf32>
    %28 = arith.addf %27, %26 : vector<128x128xf32>
    %29 = arith.divf %27, %28 : vector<128x128xf32>
    %30 = arith.mulf %24, %29 : vector<128x128xf32>
    %31 = arith.truncf %30 : vector<128x128xf32> to vector<128x128xbf16>
    %c0_8 = arith.constant 0 : index
    %c0_9 = arith.constant 0 : index
    %32 = vector.load %arg16[%c0_8, %c0_9] : memref<128x256xbf16, #tpu.memory_space<vmem>>, vector<128x128xbf16>
    tpu.vector_store %arg16[%c0_8, %c0_9], %31 {strides = array<i32>} : memref<128x256xbf16, #tpu.memory_space<vmem>>, vector<128x128xbf16>,
    %c0_10 = arith.constant 0 : index
    %c0_11 = arith.constant 0 : index
    %33 = vector.load %arg16[%c0_10, %c0_11] : memref<128x256xbf16, #tpu.memory_space<vmem>>, vector<128x256xbf16>
    %34 = arith.index_cast %arg1 : i32 to index
    %c0_12 = arith.constant 0 : index
    %c0_13 = arith.constant 0 : index
    %35 = vector.load %arg6[%34, %c0_12, %c0_13] : memref<2x256x128xbf16, #tpu.memory_space<vmem>>, vector<1x256x128xbf16>
    %36 = vector.shape_cast %35 : vector<1x256x128xbf16> to vector<256x128xbf16>
    %cst_14 = arith.constant dense<0.000000e+00> : vector<128x128xf32>
    %37 = tpu.matmul %33, %36, %cst_14 {dimension_numbers = #tpu.dot_dimension_numbers<[1], [0], [0], [1], [0, 0, 1, 1], [], []>} : vector<128x256xbf16>, vector<256x128xbf16>, vector<128x128xf32> -> vector<128x128xf32>
    %38 = arith.index_cast %arg1 : i32 to index
    %c0_15 = arith.constant 0 : index
    %c0_16 = arith.constant 0 : index
    %39 = vector.load %arg7[%38, %c0_15, %c0_16] : memref<2x1x128xf32, #tpu.memory_space<vmem>>, vector<1x1x128xf32>
    %40 = vector.shape_cast %39 : vector<1x1x128xf32> to vector<1x128xf32>
    %41 = vector.broadcast %40 : vector<1x128xf32> to vector<128x128xf32>
    %42 = arith.addf %37, %41 : vector<128x128xf32>
    %43 = arith.negf %42 : vector<128x128xf32>
    %44 = math.exp %43 : vector<128x128xf32>
    %cst_17 = arith.constant 1.000000e+00 : f32
    %45 = vector.broadcast %cst_17 : f32 to vector<128x128xf32>
    %46 = arith.addf %45, %44 : vector<128x128xf32>
    %47 = arith.divf %45, %46 : vector<128x128xf32>
    %48 = arith.mulf %42, %47 : vector<128x128xf32>
    %49 = arith.truncf %48 : vector<128x128xf32> to vector<128x128xbf16>
    %50 = arith.index_cast %arg1 : i32 to index
    %c0_18 = arith.constant 0 : index
    %c0_19 = arith.constant 0 : index
    %51 = vector.load %arg8[%50, %c0_18, %c0_19] : memref<2x128x128xbf16, #tpu.memory_space<vmem>>, vector<1x128x128xbf16>
    %52 = vector.shape_cast %51 : vector<1x128x128xbf16> to vector<128x128xbf16>
    %cst_20 = arith.constant dense<0.000000e+00> : vector<128x128xf32>
    %53 = tpu.matmul %49, %52, %cst_20 {dimension_numbers = #tpu.dot_dimension_numbers<[1], [0], [0], [1], [0, 0, 1, 1], [], []>} : vector<128x128xbf16>, vector<128x128xbf16>, vector<128x128xf32> -> vector<128x128xf32>
    %54 = arith.index_cast %arg1 : i32 to index
    %c0_21 = arith.constant 0 : index
    %c0_22 = arith.constant 0 : index
    %55 = vector.load %arg9[%54, %c0_21, %c0_22] : memref<2x1x128xf32, #tpu.memory_space<vmem>>, vector<1x1x128xf32>
    %56 = vector.shape_cast %55 : vector<1x1x128xf32> to vector<1x128xf32>
    %57 = vector.broadcast %56 : vector<1x128xf32> to vector<128x128xf32>
    %58 = arith.addf %53, %57 : vector<128x128xf32>
    %59 = arith.truncf %58 : vector<128x128xf32> to vector<128x128xbf16>
    %60 = arith.index_cast %arg1 : i32 to index
    %c0_23 = arith.constant 0 : index
    %c0_24 = arith.constant 0 : index
    %61 = vector.load %arg10[%60, %c0_23, %c0_24] : memref<2x128x128xbf16, #tpu.memory_space<vmem>>, vector<1x128x128xbf16>
    %62 = vector.shape_cast %61 : vector<1x128x128xbf16> to vector<128x128xbf16>
    %cst_25 = arith.constant dense<0.000000e+00> : vector<128x128xf32>
    %63 = tpu.matmul %59, %62, %cst_25 {dimension_numbers = #tpu.dot_dimension_numbers<[1], [0], [0], [1], [0, 0, 1, 1], [], []>} : vector<128x128xbf16>, vector<128x128xbf16>, vector<128x128xf32> -> vector<128x128xf32>
    %64 = arith.addf %3, %63 : vector<128x128xf32>
    %65 = arith.index_cast %arg1 : i32 to index
    %c0_26 = arith.constant 0 : index
    %c0_27 = arith.constant 0 : index
    %66 = vector.load %arg11[%65, %c0_26, %c0_27] : memref<2x1x128xf32, #tpu.memory_space<vmem>>, vector<1x1x128xf32>
    %67 = vector.shape_cast %66 : vector<1x1x128xf32> to vector<1x128xf32>
    %68 = vector.broadcast %67 : vector<1x128xf32> to vector<128x128xf32>
    %69 = arith.addf %64, %68 : vector<128x128xf32>
    %c0_28 = arith.constant 0 : index
    %c0_29 = arith.constant 0 : index
    %70 = vector.load %arg15[%c0_28, %c0_29] : memref<128x128xf32, #tpu.memory_space<vmem>>, vector<128x128xf32>
    tpu.vector_store %arg15[%c0_28, %c0_29], %69 {strides = array<i32>} : memref<128x128xf32, #tpu.memory_space<vmem>>, vector<128x128xf32>,
    %c1_i32 = arith.constant 1 : i32
    %71 = arith.cmpi eq, %arg1, %c1_i32 : i32
    %72 = arith.extui %71 : i1 to i32
    %c0_i32_30 = arith.constant 0 : i32
    %73 = arith.cmpi ne, %72, %c0_i32_30 : i32
    scf.if %73 {
      %74 = arith.truncf %69 : vector<128x128xf32> to vector<128x128xbf16>
      %c0_31 = arith.constant 0 : index
      %c0_32 = arith.constant 0 : index
      %75 = vector.load %arg12[%c0_31, %c0_32] : memref<128x128xbf16, #tpu.memory_space<vmem>>, vector<128x128xbf16>
      %cst_33 = arith.constant dense<0.000000e+00> : vector<128x128xf32>
      %76 = tpu.matmul %74, %75, %cst_33 {dimension_numbers = #tpu.dot_dimension_numbers<[1], [0], [0], [1], [0, 0, 1, 1], [], []>} : vector<128x128xbf16>, vector<128x128xbf16>, vector<128x128xf32> -> vector<128x128xf32>
      %c0_34 = arith.constant 0 : index
      %c0_35 = arith.constant 0 : index
      %77 = vector.load %arg13[%c0_34, %c0_35] : memref<1x128xf32, #tpu.memory_space<vmem>>, vector<1x128xf32>
      %78 = vector.broadcast %77 : vector<1x128xf32> to vector<128x128xf32>
      %79 = arith.addf %76, %78 : vector<128x128xf32>
      %c0_36 = arith.constant 0 : index
      %c0_37 = arith.constant 0 : index
      %80 = vector.load %arg14[%c0_36, %c0_37] : memref<128x128xf32, #tpu.memory_space<vmem>>, vector<128x128xf32>
      tpu.vector_store %arg14[%c0_36, %c0_37], %79 {strides = array<i32>} : memref<128x128xf32, #tpu.memory_space<vmem>>, vector<128x128xf32>,
    } else {
    }
    return
  }
  func.func @transform_0(%arg0: i32, %arg1: i32) -> (i32, i32) {
    %c0_i32 = arith.constant 0 : i32
    %c0_i32_0 = arith.constant 0 : i32
    return %arg0, %c0_i32 : i32, i32
  }
  func.func @transform_1(%arg0: i32, %arg1: i32) -> (i32, i32) {
    %c0_i32 = arith.constant 0 : i32
    %c0_i32_0 = arith.constant 0 : i32
    return %arg0, %c0_i32 : i32, i32
  }
  func.func @transform_2(%arg0: i32, %arg1: i32) -> (i32, i32) {
    %c0_i32 = arith.constant 0 : i32
    %c0_i32_0 = arith.constant 0 : i32
    %c0_i32_1 = arith.constant 0 : i32
    return %c0_i32, %c0_i32_0 : i32, i32
  }
  func.func @transform_3(%arg0: i32, %arg1: i32) -> (i32, i32) {
    %c0_i32 = arith.constant 0 : i32
    %c0_i32_0 = arith.constant 0 : i32
    %c0_i32_1 = arith.constant 0 : i32
    return %c0_i32, %c0_i32_0 : i32, i32
  }
  func.func @transform_4(%arg0: i32, %arg1: i32) -> (i32, i32, i32) {
    %c0_i32 = arith.constant 0 : i32
    %c0_i32_0 = arith.constant 0 : i32
    %c0_i32_1 = arith.constant 0 : i32
    %c0_i32_2 = arith.constant 0 : i32
    return %c0_i32, %c0_i32_0, %c0_i32_1 : i32, i32, i32
  }
  func.func @transform_5(%arg0: i32, %arg1: i32) -> (i32, i32, i32) {
    %c0_i32 = arith.constant 0 : i32
    %c0_i32_0 = arith.constant 0 : i32
    %c0_i32_1 = arith.constant 0 : i32
    %c0_i32_2 = arith.constant 0 : i32
    return %c0_i32, %c0_i32_0, %c0_i32_1 : i32, i32, i32
  }
  func.func @transform_6(%arg0: i32, %arg1: i32) -> (i32, i32, i32) {
    %c0_i32 = arith.constant 0 : i32
    %c0_i32_0 = arith.constant 0 : i32
    %c0_i32_1 = arith.constant 0 : i32
    %c0_i32_2 = arith.constant 0 : i32
    return %c0_i32, %c0_i32_0, %c0_i32_1 : i32, i32, i32
  }
  func.func @transform_7(%arg0: i32, %arg1: i32) -> (i32, i32, i32) {
    %c0_i32 = arith.constant 0 : i32
    %c0_i32_0 = arith.constant 0 : i32
    %c0_i32_1 = arith.constant 0 : i32
    %c0_i32_2 = arith.constant 0 : i32
    return %c0_i32, %c0_i32_0, %c0_i32_1 : i32, i32, i32
  }
  func.func @transform_8(%arg0: i32, %arg1: i32) -> (i32, i32, i32) {
    %c0_i32 = arith.constant 0 : i32
    %c0_i32_0 = arith.constant 0 : i32
    %c0_i32_1 = arith.constant 0 : i32
    %c0_i32_2 = arith.constant 0 : i32
    return %c0_i32, %c0_i32_0, %c0_i32_1 : i32, i32, i32
  }
  func.func @transform_9(%arg0: i32, %arg1: i32) -> (i32, i32, i32) {
    %c0_i32 = arith.constant 0 : i32
    %c0_i32_0 = arith.constant 0 : i32
    %c0_i32_1 = arith.constant 0 : i32
    %c0_i32_2 = arith.constant 0 : i32
    return %c0_i32, %c0_i32_0, %c0_i32_1 : i32, i32, i32
  }
  func.func @transform_10(%arg0: i32, %arg1: i32) -> (i32, i32) {
    %c0_i32 = arith.constant 0 : i32
    %c0_i32_0 = arith.constant 0 : i32
    %c0_i32_1 = arith.constant 0 : i32
    return %c0_i32, %c0_i32_0 : i32, i32
  }
  func.func @transform_11(%arg0: i32, %arg1: i32) -> (i32, i32) {
    %c0_i32 = arith.constant 0 : i32
    %c0_i32_0 = arith.constant 0 : i32
    %c0_i32_1 = arith.constant 0 : i32
    return %c0_i32, %c0_i32_0 : i32, i32
  }
  func.func @transform_12(%arg0: i32, %arg1: i32) -> (i32, i32) {
    %c0_i32 = arith.constant 0 : i32
    %c0_i32_0 = arith.constant 0 : i32
    return %arg0, %c0_i32 : i32, i32
  }
}

</mosaic_0001>

<bundles_post_ra>
// kernel: resnet_forward.1
= control target key start
LH: loop header
LB: loop body
LE: loop exit
PB: predicated region body
PF: predicated region fallthrough
CT: control target
= control target key end

     0   :  { %s2968_s21 = smov 0   ;;  %s2970_s22 = smov 0   ;;  %s3498_s0 = inlined_call_operand.vmem [shape: bf16[256,128], index: 0, kind: input, shape index: {}]   ;;  %s3499_s1 = inlined_call_operand.vmem [shape: bf16[256,128], index: 1, kind: input, shape index: {}]   ;;  %s3500_s2 = inlined_call_operand.vmem [shape: bf16[128,128], index: 2, kind: input, shape index: {}]   ;;  %s3501_s3 = inlined_call_operand.vmem [shape: f32[1,128], index: 3, kind: input, shape index: {}]   ;;  %s3502_s4 = inlined_call_operand.vmem [shape: bf16[2,256,128], index: 4, kind: input, shape index: {}]   ;;  %s3503_s5 = inlined_call_operand.vmem [shape: f32[2,1,128], index: 5, kind: input, shape index: {}]   ;;  %s3504_s6 = inlined_call_operand.vmem [shape: bf16[2,128,128], index: 6, kind: input, shape index: {}]   ;;  %s3505_s7 = inlined_call_operand.vmem [shape: f32[2,1,128], index: 7, kind: input, shape index: {}]   ;;  %s3506_s8 = inlined_call_operand.vmem [shape: bf16[2,128,128], index: 8, kind: input, shape index: {}]   ;;  %s3507_s9 = inlined_call_operand.vmem [shape: f32[2,1,128], index: 9, kind: input, shape index: {}]   ;;  %s3508_s10 = inlined_call_operand.vmem [shape: bf16[128,128], index: 10, kind: input, shape index: {}]   ;;  %s3509_s11 = inlined_call_operand.vmem [shape: f32[1,128], index: 11, kind: input, shape index: {}]   ;;  %s3510_s12 = inlined_call_operand.vmem [shape: f32[256,128], index: 12, kind: output, shape index: {}]  }
   0x1   :  { %s2972_s23 = smov 0   ;;  %s2974_s24 = smov 0  }
   0x2   :  { %s2976_s25 = smov 0  }
   0x3 LB: > { %s31_s26 = sadd.s32 1, %s2893_s23  ;;  %s34_s27 = sadd.s32 1, %s2897_s24  ;;  %s2901_s25 = sphi %s2976_s25, %s22_s25   ;;  %s2897_s24 = sphi %s2974_s24, %s3516_s24   ;;  %s2893_s23 = sphi %s2972_s23, %s3515_s23   ;;  %s2889_s22 = sphi %s2970_s22, %s3514_s22   ;;  %s2885_s21 = sphi %s2968_s21, %s3513_s21  }
   0x4   : > { %p32_p0 = scmp.ge.s32.totalorder %s31_s26, 2  ;;  %p2175_p1 = scmp.ge.s32.totalorder %s2901_s25, 1 }
   0x5   : > { %p386_p2 = scmp.lt.s32.totalorder %s2901_s25, 5 }
   0x6   : > { %s3518_s26 = smov (%p32_p0, %s31_s26), 0  ;;  %s3520_s27 = smov (!%p32_p0, %s34_s27), %s2897_s24 }
   0x7   : > { %p387_p3 = pnand %p2175_p1, %p386_p2  ;;  %p36_p4 = scmp.ge.s32.totalorder %s3520_s27, 2 }
   0x8   : > { %s2176_s28 = sshll.u32 (!%p387_p3), %s2889_s22, 4  ;;  %p2182_p6 = scmp.ne.s32.totalorder (!%p387_p3), %s2885_s21, 0 }
   0x9   : > { %s3522_s27 = smov (%p36_p4, %s3520_s27), 0  ;;  %390 = sbr.rel (%p387_p3) target bundleno = 1612 (0x64c), region = 68 }
   0xa   : > { %3511 = sst [smem:[#allocation4_spill]] %s3522_s27  ;;  %p434_p5 = scmp.lt.s32.totalorder (!%p387_p3), %s2176_s28, 31 }
  0x10   : > { %s3524_s28 = smov (!%p434_p5, %s2176_s28), 31  ;;  %455 = sbr.rel (%p2182_p6) target bundleno = 276 (0x114), region = 72 }
  0x11   : > { %s2177_s29 = sshll.u32 %s3524_s28, 2  ;;  %s2181_s30 = sshll.u32 %s3524_s28, 3  ;;  %v2623_v0 = vld [vmem:[%s3500_s2] sm:$0xff] (!%p2182_p6)   ;;  %v2624_v1 = vld [vmem:[%s3500_s2 + $0x8] sm:$0xff] (!%p2182_p6)   ;;  %v2625_v2 = vld [vmem:[%s3500_s2 + $0x10] sm:$0xff] (!%p2182_p6)  }
  0x12   : > { %s3003_s15 = scalar_lea.vmem %s3498_s0, %s2177_s29  ;;  %s3008_s18 = scalar_lea.vmem %s3499_s1, %s2177_s29  ;;  %2423 = vmatprep.subr.bf16.mxu0 (!%p2182_p6), %v2623_v0  ;;  %2551 = vmatprep.subr.bf16.mxu1 (!%p2182_p6), %v2623_v0  ;;  %v2626_v3 = vld [vmem:[%s3500_s2 + $0x18] sm:$0xff] (!%p2182_p6)   ;;  %v2627_v6 = vld [vmem:[%s3500_s2 + $0x20] sm:$0xff] (!%p2182_p6)   ;;  %v2628_v7 = vld [vmem:[%s3500_s2 + $0x28] sm:$0xff] (!%p2182_p6)  }
  0x13   : > { %s3013_s27 = scalar_lea.vmem %s3510_s12, %s2181_s30  ;;  %2424 = vmatpush3.bf16.msra.mxu0 (!%p2182_p6), %v2623_v0  ;;  %2559 = vmatpush3.bf16.msra.mxu1 (!%p2182_p6), %v2623_v0  ;;  %v2631_v4 = vld [vmem:[%s3003_s15] sm:$0xff] (!%p2182_p6)   ;;  %v2629_v8 = vld [vmem:[%s3500_s2 + $0x30] sm:$0xff] (!%p2182_p6)   ;;  %v2630_v9 = vld [vmem:[%s3500_s2 + $0x38] sm:$0xff] (!%p2182_p6)  }
  0x14   : > { %2425 = vmatprep.subr.bf16.mxu0 (!%p2182_p6), %v2624_v1  ;;  %2552 = vmatprep.subr.bf16.mxu1 (!%p2182_p6), %v2624_v1  ;;  %v2632_v5 = vld [vmem:[%s3003_s15 + $0x20] sm:$0xff] (!%p2182_p6)   ;;  %v2633_v10 = vld [vmem:[%s3003_s15 + $0x8] sm:$0xff] (!%p2182_p6)   ;;  %v2635_v12 = vld [vmem:[%s3003_s15 + $0x10] sm:$0xff] (!%p2182_p6)  }
  0x15   : > { %2439 = vmatprep.mubr.bf16.mxu0 (!%p2182_p6), %v2631_v4  ;;  %2447 = vmatprep.mubr.bf16.mxu1 (!%p2182_p6), %v2632_v5  ;;  %v2634_v11 = vld [vmem:[%s3003_s15 + $0x28] sm:$0xff] (!%p2182_p6)   ;;  %v2636_v13 = vld [vmem:[%s3003_s15 + $0x30] sm:$0xff] (!%p2182_p6)   ;;  %v2637_v14 = vld [vmem:[%s3003_s15 + $0x18] sm:$0xff] (!%p2182_p6)  }
  0x16   : > { %v2638_v15 = vld [vmem:[%s3003_s15 + $0x38] sm:$0xff] (!%p2182_p6)   ;;  %v2639_v16 = vld [vmem:[%s3008_s18] sm:$0xff] (!%p2182_p6)   ;;  %v2640_v17 = vld [vmem:[%s3008_s18 + $0x8] sm:$0xff] (!%p2182_p6)  }
  0x17   : > { %2426 = vmatpush3.bf16.msra.mxu0 %v2624_v1  ;;  %2560 = vmatpush3.bf16.msra.mxu1 %v2624_v1  ;;  %v2641_v18 = vld [vmem:[%s3008_s18 + $0x10] sm:$0xff]   ;;  %v2642_v19 = vld [vmem:[%s3008_s18 + $0x18] sm:$0xff]   ;;  %v2643_v20 = vld [vmem:[%s3008_s18 + $0x20] sm:$0xff]   ;;  %768 = vst [vmem:[#allocation3 + $0x8] sm:$0xff] %v2639_v16 }
  0x18   : > { %2427 = vmatprep.subr.bf16.mxu0 %v2625_v2  ;;  %2553 = vmatprep.subr.bf16.mxu1 %v2625_v2  ;;  %v2644_v21 = vld [vmem:[%s3008_s18 + $0x28] sm:$0xff]   ;;  %v2645_v22 = vld [vmem:[%s3008_s18 + $0x30] sm:$0xff]   ;;  %v2646_v23 = vld [vmem:[%s3008_s18 + $0x38] sm:$0xff]   ;;  %769 = vst [vmem:[#allocation3 + $0x18] sm:$0xff] %v2640_v17 }
  0x19   : > { %770 = vst [vmem:[#allocation3 + $0x28] sm:$0xff] %v2641_v18  ;;  %771 = vst [vmem:[#allocation3 + $0x38] sm:$0xff] %v2642_v19  ;;  %v2183_v24 = vld [vmem:[%s3501_s3] ss:$0 sm:$0xff] }
  0x1a   : > { %772 = vst [vmem:[#allocation3 + $0x48] sm:$0xff] %v2643_v20  ;;  %773 = vst [vmem:[#allocation3 + $0x58] sm:$0xff] %v2644_v21 }
  0x1b   : > { %2428 = vmatpush3.bf16.msra.mxu0 %v2625_v2  ;;  %2561 = vmatpush3.bf16.msra.mxu1 %v2625_v2  ;;  %774 = vst [vmem:[#allocation3 + $0x68] sm:$0xff] %v2645_v22  ;;  %775 = vst [vmem:[#allocation3 + $0x78] sm:$0xff] %v2646_v23 }
  0x1c   : > { %2429 = vmatprep.subr.bf16.mxu0 %v2626_v3  ;;  %2554 = vmatprep.subr.bf16.mxu1 %v2626_v3 }
  0x1f   : > { %2430 = vmatpush3.bf16.msra.mxu0 %v2626_v3  ;;  %2562 = vmatpush3.bf16.msra.mxu1 %v2626_v3 }
  0x20   : > { %2431 = vmatprep.subr.bf16.mxu0 %v2627_v6  ;;  %2555 = vmatprep.subr.bf16.mxu1 %v2627_v6 }
  0x23   : > { %2432 = vmatpush3.bf16.msra.mxu0 %v2627_v6  ;;  %2563 = vmatpush3.bf16.msra.mxu1 %v2627_v6 }
  0x24   : > { %2433 = vmatprep.subr.bf16.mxu0 %v2628_v7  ;;  %2556 = vmatprep.subr.bf16.mxu1 %v2628_v7 }
  0x27   : > { %2434 = vmatpush3.bf16.msra.mxu0 %v2628_v7  ;;  %2564 = vmatpush3.bf16.msra.mxu1 %v2628_v7 }
  0x28   : > { %2435 = vmatprep.subr.bf16.mxu0 %v2629_v8  ;;  %2557 = vmatprep.subr.bf16.mxu1 %v2629_v8 }
  0x2b   : > { %2436 = vmatpush3.bf16.msra.mxu0 %v2629_v8  ;;  %2565 = vmatpush3.bf16.msra.mxu1 %v2629_v8 }
  0x2c   : > { %2437 = vmatprep.subr.bf16.mxu0 %v2630_v9  ;;  %2558 = vmatprep.subr.bf16.mxu1 %v2630_v9 }
  0x2f   : > { %2438 = vmatpush3.bf16.msra.mxu0 %v2630_v9  ;;  %2566 = vmatpush3.bf16.msra.mxu1 %v2630_v9 }
  0x32   : > { %2440 = vmatmul.mubr.bf16.vlgmr.msra.gmra.mrb[0].mxu0 %v2633_v10  ;;  %2448 = vmatmul.mubr.bf16.vlgmr.msra.gmra.mrb[0].mxu1 %v2634_v11 }
  0x33   : > { %2443 = vmatprep.mubr.bf16.mxu0 %v2635_v12  ;;  %2451 = vmatprep.mubr.bf16.mxu1 %v2636_v13 }
  0x3a   : > { %2444 = vmatmul.mubr.bf16.gmra.mrb[4].mxu0 %v2637_v14  ;;  %2452 = vmatmul.mubr.bf16.gmra.mrb[4].mxu1 %v2638_v15 }
 0x105   : > { %v2441_v25 = vpop.f32.mrb[0].mxu0  ;;  %v2449_v26 = vpop.f32.mrb[0].mxu1 }
 0x106   : > { %v634_v27 = vadd.f32 %v2441_v25, %v2183_v24  ;;  %v666_v28 = vadd.f32 %v2449_v26, %v2183_v24  ;;  %v625_v29 = vpop.f32.mrb[1].mxu0  ;;  %v657_v30 = vpop.f32.mrb[1].mxu1 }
 0x107   : > { %v626_v31 = vadd.f32 %v2183_v24, %v625_v29  ;;  %v658_v32 = vadd.f32 %v2183_v24, %v657_v30  ;;  %v2442_v33 = vpop.f32.mrb[2].mxu0  ;;  %v2450_v34 = vpop.f32.mrb[2].mxu1 }
 0x108   : > { %690 = vst [vmem:[#allocation2 + $0x10] sm:$0xff] %v634_v27  ;;  %698 = vst [vmem:[#allocation2 + $0x50] sm:$0xff] %v666_v28  ;;  %v637_v35 = vadd.f32 %v2442_v33, %v2183_v24  ;;  %v669_v36 = vadd.f32 %v2450_v34, %v2183_v24  ;;  %v628_v37 = vpop.f32.mrb[3].mxu0  ;;  %v660_v38 = vpop.f32.mrb[3].mxu1 }
 0x109   : > { %688 = vst [vmem:[#allocation2] sm:$0xff] %v626_v31  ;;  %696 = vst [vmem:[#allocation2 + $0x40] sm:$0xff] %v658_v32  ;;  %v629_v39 = vadd.f32 %v2183_v24, %v628_v37  ;;  %v661_v40 = vadd.f32 %v2183_v24, %v660_v38 }
 0x10a   : > { %691 = vst [vmem:[#allocation2 + $0x18] sm:$0xff] %v637_v35  ;;  %699 = vst [vmem:[#allocation2 + $0x58] sm:$0xff] %v669_v36 }
 0x10b   : > { %689 = vst [vmem:[#allocation2 + $0x8] sm:$0xff] %v629_v39  ;;  %697 = vst [vmem:[#allocation2 + $0x48] sm:$0xff] %v661_v40 }
 0x10d   : > { %v2445_v41 = vpop.f32.mrb[4].mxu0  ;;  %v2453_v42 = vpop.f32.mrb[4].mxu1 }
 0x10e   : > { %v650_v43 = vadd.f32 %v2445_v41, %v2183_v24  ;;  %v682_v44 = vadd.f32 %v2453_v42, %v2183_v24  ;;  %v641_v45 = vpop.f32.mrb[5].mxu0  ;;  %v673_v46 = vpop.f32.mrb[5].mxu1 }
 0x10f   : > { %v642_v47 = vadd.f32 %v2183_v24, %v641_v45  ;;  %v674_v48 = vadd.f32 %v2183_v24, %v673_v46  ;;  %v2446_v49 = vpop.f32.mrb[6].mxu0  ;;  %v2454_v50 = vpop.f32.mrb[6].mxu1 }
 0x110   : > { %694 = vst [vmem:[#allocation2 + $0x30] sm:$0xff] %v650_v43  ;;  %702 = vst [vmem:[#allocation2 + $0x70] sm:$0xff] %v682_v44  ;;  %v653_v51 = vadd.f32 %v2446_v49, %v2183_v24  ;;  %v685_v52 = vadd.f32 %v2454_v50, %v2183_v24  ;;  %v644_v53 = vpop.f32.mrb[7].mxu0  ;;  %v676_v54 = vpop.f32.mrb[7].mxu1 }
 0x111   : > { %692 = vst [vmem:[#allocation2 + $0x20] sm:$0xff] %v642_v47  ;;  %700 = vst [vmem:[#allocation2 + $0x60] sm:$0xff] %v674_v48  ;;  %v645_v55 = vadd.f32 %v2183_v24, %v644_v53  ;;  %v677_v56 = vadd.f32 %v2183_v24, %v676_v54 }
 0x112   : > { %695 = vst [vmem:[#allocation2 + $0x38] sm:$0xff] %v653_v51  ;;  %703 = vst [vmem:[#allocation2 + $0x78] sm:$0xff] %v685_v52 }
 0x113   : > { %693 = vst [vmem:[#allocation2 + $0x28] sm:$0xff] %v645_v55  ;;  %701 = vst [vmem:[#allocation2 + $0x68] sm:$0xff] %v677_v56 }
 0x114 PF: > { %v776_v57 = vld [vmem:[#allocation2] sm:$0xff]  ;;  %v778_v58 = vld [vmem:[#allocation2 + $0x10] sm:$0xff]  ;;  %v777_v59 = vld [vmem:[#allocation2 + $0x8] sm:$0xff]  ;;  %v856_v9 = vlaneseq  ;;  %s2292_s18 = sshll.u32 %s2885_s21, 7  ;;  %s2293_s22 = sshll.u32 %s2885_s21, 6 }
 0x115   : > { %792 = vadd.xlane.f32.xlu0 %v776_v57  ;;  %796 = vadd.xlane.f32.xlu1 %v778_v58  ;;  %v779_v60 = vld [vmem:[#allocation2 + $0x18] sm:$0xff]  ;;  %v3065_v1 = vld [vmem:[#allocation2 + $0x40] sm:$0xff]  ;;  %v3067_v2 = vld [vmem:[#allocation2 + $0x48] sm:$0xff]  ;;  %s1133_s20 = scalar_lea.vmem %s3502_s4, %s2292_s18  ;;  %s1489_s14 = scalar_lea.vmem %s3504_s6, %s2293_s22 }
 0x116   : > { %v3071_v3 = vld [vmem:[#allocation2 + $0x50] sm:$0xff]  ;;  %v3073_v4 = vld [vmem:[#allocation2 + $0x58] sm:$0xff]  ;;  %v3089_v10 = vand.u32 127, %v856_v9  ;;  %s3285_s16 = scalar_lea.vmem %s3506_s8, %s2293_s22  ;;  %s1166_s17 = scalar_lea.vmem %s3503_s5, %s2885_s21 }
 0x117   : > { %v3059_v63 = vld [vmem:[#allocation2 + $0x30] sm:$0xff]  ;;  %s1506_s22 = scalar_lea.vmem %s3505_s7, %s2885_s21  ;;  %p2280_p7 = scmp.ne.s32.totalorder %s2885_s21, 1 }
 0x118   : > { %v780_v61 = vld [vmem:[#allocation2 + $0x20] sm:$0xff]  ;;  %v3083_v7 = vld [vmem:[#allocation2 + $0x70] sm:$0xff]  ;;  %vm858_vm0 = vcmp.lt.s32.totalorder %v3089_v10, 32  ;;  %v2649_v10 = vld [vmem:[%s1133_s20 + $0x48] sm:$0xff]  }
 0x119   : > { %794 = vadd.xlane.f32.xlu0 %v777_v59  ;;  %798 = vadd.xlane.f32.xlu1 %v779_v60  ;;  %v3061_v0 = vld [vmem:[#allocation2 + $0x38] sm:$0xff]  ;;  %v3077_v5 = vld [vmem:[#allocation2 + $0x60] sm:$0xff] }
 0x11a   : > { %v781_v62 = vld [vmem:[#allocation2 + $0x28] sm:$0xff]  ;;  %v3085_v8 = vld [vmem:[#allocation2 + $0x78] sm:$0xff] }
 0x11b   : > { %v3079_v6 = vld [vmem:[#allocation2 + $0x68] sm:$0xff] }
 0x11d   : > { %800 = vadd.xlane.f32.xlu0 %v780_v61  ;;  %802 = vadd.xlane.f32.xlu1 %v781_v62 }
 0x121   : > { %804 = vadd.xlane.f32.xlu0 %v3059_v63  ;;  %806 = vadd.xlane.f32.xlu1 %v3061_v0 }
 0x125   : > { %808 = vadd.xlane.f32.xlu0 %v3065_v1  ;;  %810 = vadd.xlane.f32.xlu1 %v3067_v2 }
 0x129   : > { %812 = vadd.xlane.f32.xlu0 %v3071_v3  ;;  %814 = vadd.xlane.f32.xlu1 %v3073_v4 }
 0x12d   : > { %816 = vadd.xlane.f32.xlu0 %v3077_v5  ;;  %818 = vadd.xlane.f32.xlu1 %v3079_v6 }
 0x131   : > { %820 = vadd.xlane.f32.xlu0 %v3083_v7  ;;  %822 = vadd.xlane.f32.xlu1 %v3085_v8 }
 0x1a2   : > { %v793_v11 = vpop.xlane.xlu0 %792  ;;  %v797_v12 = vpop.xlane.xlu1 %796 }
 0x1a3   : > { %v824_v13 = vmul.f32 0.03125, %v793_v11  ;;  %v826_v14 = vmul.f32 0.03125, %v797_v12 }
 0x1a5   : > { %v840_v15 = vsub.f32 %v776_v57, %v824_v13  ;;  %v842_v16 = vsub.f32 %v778_v58, %v826_v14 }
 0x1a6   : > { %v795_v17 = vpop.xlane.xlu0 %794  ;;  %v799_v18 = vpop.xlane.xlu1 %798 }
 0x1a7   : > { %v825_v19 = vmul.f32 0.03125, %v795_v17  ;;  %v827_v20 = vmul.f32 0.03125, %v799_v18  ;;  %v3094_v21 = vsel %vm858_vm0, %v840_v15, 0.0  ;;  %v3098_v22 = vsel %vm858_vm0, %v842_v16, 0.0 }
 0x1a8   : > { %v875_v23 = vmul.f32 %v3094_v21, %v3094_v21  ;;  %v877_v28 = vmul.f32 %v3098_v22, %v3098_v22 }
 0x1a9   : > { %v841_v24 = vsub.f32 %v777_v59, %v825_v19  ;;  %v843_v25 = vsub.f32 %v779_v60, %v827_v20 }
 0x1aa   : > { %891 = vadd.xlane.f32.xlu0 %v875_v23  ;;  %v801_v26 = vpop.xlane.xlu0 %800  ;;  %v803_v27 = vpop.xlane.xlu1 %802 }
 0x1ab   : > { %v828_v29 = vmul.f32 0.03125, %v801_v26  ;;  %v829_v30 = vmul.f32 0.03125, %v803_v27  ;;  %v3106_v31 = vsel %vm858_vm0, %v841_v24, 0.0  ;;  %v3110_v32 = vsel %vm858_vm0, %v843_v25, 0.0 }
 0x1ac   : > { %v876_v33 = vmul.f32 %v3106_v31, %v3106_v31  ;;  %v878_v38 = vmul.f32 %v3110_v32, %v3110_v32 }
 0x1ad   : > { %v844_v34 = vsub.f32 %v780_v61, %v828_v29  ;;  %v845_v35 = vsub.f32 %v781_v62, %v829_v30 }
 0x1ae   : > { %895 = vadd.xlane.f32.xlu0 %v877_v28  ;;  %893 = vadd.xlane.f32.xlu1 %v876_v33  ;;  %v805_v36 = vpop.xlane.xlu0 %804  ;;  %v807_v37 = vpop.xlane.xlu1 %806  ;;  %v2648_v33 = vld [vmem:[%s1133_s20] sm:$0xff]  }
 0x1af   : > { %v830_v39 = vmul.f32 0.03125, %v805_v36  ;;  %v831_v40 = vmul.f32 0.03125, %v807_v37  ;;  %v3118_v41 = vsel %vm858_vm0, %v844_v34, 0.0  ;;  %v3122_v42 = vsel %vm858_vm0, %v845_v35, 0.0  ;;  %v2650_v34 = vld [vmem:[%s1133_s20 + $0x8] sm:$0xff]   ;;  %v2651_v35 = vld [vmem:[%s1133_s20 + $0x50] sm:$0xff]  }
 0x1b0   : > { %v879_v43 = vmul.f32 %v3118_v41, %v3118_v41  ;;  %v880_v48 = vmul.f32 %v3122_v42, %v3122_v42  ;;  %v2652_v36 = vld [vmem:[%s1133_s20 + $0x10] sm:$0xff]   ;;  %v2653_v37 = vld [vmem:[%s1133_s20 + $0x58] sm:$0xff]  }
 0x1b1   : > { %v846_v44 = vsub.f32 %v3059_v63, %v830_v39  ;;  %v847_v45 = vsub.f32 %v3061_v0, %v831_v40  ;;  %v2655_v39 = vld [vmem:[%s1133_s20 + $0x60] sm:$0xff]  }
 0x1b2   : > { %897 = vadd.xlane.f32.xlu1 %v878_v38  ;;  %899 = vadd.xlane.f32.xlu0 %v879_v43  ;;  %v809_v46 = vpop.xlane.xlu0 %808  ;;  %v811_v47 = vpop.xlane.xlu1 %810  ;;  %v2654_v38 = vld [vmem:[%s1133_s20 + $0x18] sm:$0xff]   ;;  %v2656_v40 = vld [vmem:[%s1133_s20 + $0x20] sm:$0xff]   ;;  %v2657_v43 = vld [vmem:[%s1133_s20 + $0x68] sm:$0xff]  }
 0x1b3   : > { %v832_v49 = vmul.f32 0.03125, %v809_v46  ;;  %v833_v50 = vmul.f32 0.03125, %v811_v47  ;;  %v3132_v51 = vsel %vm858_vm0, %v846_v44, 0.0  ;;  %v3136_v52 = vsel %vm858_vm0, %v847_v45, 0.0  ;;  %v2658_v44 = vld [vmem:[%s1133_s20 + $0x28] sm:$0xff]   ;;  %v2659_v45 = vld [vmem:[%s1133_s20 + $0x70] sm:$0xff]  }
 0x1b4   : > { %v881_v53 = vmul.f32 %v3132_v51, %v3132_v51  ;;  %v882_v58 = vmul.f32 %v3136_v52, %v3136_v52  ;;  %v2660_v46 = vld [vmem:[%s1133_s20 + $0x30] sm:$0xff]   ;;  %v2661_v47 = vld [vmem:[%s1133_s20 + $0x78] sm:$0xff]  }
 0x1b5   : > { %v848_v54 = vsub.f32 %v3065_v1, %v832_v49  ;;  %v849_v55 = vsub.f32 %v3067_v2, %v833_v50  ;;  %v1116_v49 = vld [vmem:[#allocation3 + $0x8] sm:$0xff] }
 0x1b6   : > { %901 = vadd.xlane.f32.xlu1 %v880_v48  ;;  %903 = vadd.xlane.f32.xlu0 %v881_v53  ;;  %v813_v56 = vpop.xlane.xlu0 %812  ;;  %v815_v57 = vpop.xlane.xlu1 %814  ;;  %v2662_v48 = vld [vmem:[%s1133_s20 + $0x38] sm:$0xff]  }
 0x1b7   : > { %v834_v59 = vmul.f32 0.03125, %v813_v56  ;;  %v835_v60 = vmul.f32 0.03125, %v815_v57  ;;  %v3146_v61 = vsel %vm858_vm0, %v848_v54, 0.0  ;;  %v3150_v62 = vsel %vm858_vm0, %v849_v55, 0.0  ;;  %1302 = vmatprep.mubr.bf16.mxu0 %v1116_v49 }
 0x1b8   : > { %v883_v63 = vmul.f32 %v3146_v61, %v3146_v61  ;;  %v884_v11 = vmul.f32 %v3150_v62, %v3150_v62 }
 0x1b9   : > { %v850_v0 = vsub.f32 %v3071_v3, %v834_v59  ;;  %v851_v1 = vsub.f32 %v3073_v4, %v835_v60 }
 0x1ba   : > { %905 = vadd.xlane.f32.xlu1 %v882_v58  ;;  %907 = vadd.xlane.f32.xlu0 %v883_v63  ;;  %v817_v2 = vpop.xlane.xlu0 %816  ;;  %v819_v9 = vpop.xlane.xlu1 %818 }
 0x1bb   : > { %v836_v12 = vmul.f32 0.03125, %v817_v2  ;;  %v837_v13 = vmul.f32 0.03125, %v819_v9  ;;  %v3160_v14 = vsel %vm858_vm0, %v850_v0, 0.0  ;;  %v3164_v15 = vsel %vm858_vm0, %v851_v1, 0.0 }
 0x1bc   : > { %v885_v3 = vmul.f32 %v3160_v14, %v3160_v14  ;;  %v886_v19 = vmul.f32 %v3164_v15, %v3164_v15 }
 0x1bd   : > { %v852_v4 = vsub.f32 %v3077_v5, %v836_v12  ;;  %v853_v16 = vsub.f32 %v3079_v6, %v837_v13 }
 0x1be   : > { %909 = vadd.xlane.f32.xlu1 %v884_v11  ;;  %911 = vadd.xlane.f32.xlu0 %v885_v3  ;;  %v821_v17 = vpop.xlane.xlu0 %820  ;;  %v823_v18 = vpop.xlane.xlu1 %822 }
 0x1bf   : > { %v838_v20 = vmul.f32 0.03125, %v821_v17  ;;  %v839_v23 = vmul.f32 0.03125, %v823_v18  ;;  %v3174_v24 = vsel %vm858_vm0, %v852_v4, 0.0  ;;  %v3178_v25 = vsel %vm858_vm0, %v853_v16, 0.0 }
 0x1c0   : > { %v887_v5 = vmul.f32 %v3174_v24, %v3174_v24  ;;  %v888_v27 = vmul.f32 %v3178_v25, %v3178_v25 }
 0x1c1   : > { %v854_v6 = vsub.f32 %v3083_v7, %v838_v20  ;;  %v855_v26 = vsub.f32 %v3085_v8, %v839_v23  ;;  %v2647_v8 = vld [vmem:[%s1133_s20 + $0x40] sm:$0xff]  }
 0x1c2   : > { %913 = vadd.xlane.f32.xlu1 %v886_v19  ;;  %915 = vadd.xlane.f32.xlu0 %v887_v5 }
 0x1c3   : > { %v3188_v28 = vsel %vm858_vm0, %v854_v6, 0.0  ;;  %v3192_v29 = vsel %vm858_vm0, %v855_v26, 0.0  ;;  %2311 = vmatprep.subr.bf16.mxu0 %v2647_v8 }
 0x1c4   : > { %v889_v30 = vmul.f32 %v3188_v28, %v3188_v28  ;;  %v890_v7 = vmul.f32 %v3192_v29, %v3192_v29  ;;  %2312 = vmatpush3.bf16.msra.mxu0 %v2648_v33 }
 0x1c5   : > { %2313 = vmatprep.subr.bf16.mxu0 %v2649_v10 }
 0x1c6   : > { %917 = vadd.xlane.f32.xlu1 %v888_v27  ;;  %919 = vadd.xlane.f32.xlu0 %v889_v30 }
 0x1c8   : > { %2314 = vmatpush3.bf16.msra.mxu0 %v2650_v34 }
 0x1c9   : > { %2315 = vmatprep.subr.bf16.mxu0 %v2651_v35 }
 0x1ca   : > { %921 = vadd.xlane.f32.xlu1 %v890_v7 }
 0x1cc   : > { %2316 = vmatpush3.bf16.msra.mxu0 %v2652_v36 }
 0x1cd   : > { %2317 = vmatprep.subr.bf16.mxu0 %v2653_v37 }
 0x1d0   : > { %2318 = vmatpush3.bf16.msra.mxu0 %v2654_v38 }
 0x1d1   : > { %2319 = vmatprep.subr.bf16.mxu0 %v2655_v39 }
 0x1d4   : > { %2320 = vmatpush3.bf16.msra.mxu0 %v2656_v40 }
 0x1d5   : > { %2321 = vmatprep.subr.bf16.mxu0 %v2657_v43 }
 0x1d8   : > { %2322 = vmatpush3.bf16.msra.mxu0 %v2658_v44 }
 0x1d9   : > { %2323 = vmatprep.subr.bf16.mxu0 %v2659_v45 }
 0x1dc   : > { %2324 = vmatpush3.bf16.msra.mxu0 %v2660_v46 }
 0x1dd   : > { %2325 = vmatprep.subr.bf16.mxu0 %v2661_v47 }
 0x1e0   : > { %2326 = vmatpush3.bf16.msra.mxu0 %v2662_v48 }
 0x237   : > { %v892_v50 = vpop.xlane.xlu0 %891 }
 0x238   : > { %v923_v53 = vmul.f32 0.03125, %v892_v50 }
 0x23a   : > { %v939_v54 = vadd.f32 1e-05, %v923_v53 }
 0x23b   : > { %v894_v55 = vpop.xlane.xlu1 %893  ;;  %v896_v56 = vpop.xlane.xlu0 %895 }
 0x23c   : > { %2679 = vrsqrt.f32 %v939_v54  ;;  %v924_v57 = vmul.f32 0.03125, %v894_v55  ;;  %v925_v58 = vmul.f32 0.03125, %v896_v56 }
 0x23e   : > { %v940_v59 = vadd.f32 1e-05, %v924_v57  ;;  %v941_v60 = vadd.f32 1e-05, %v925_v58 }
 0x23f   : > { %v898_v63 = vpop.xlane.xlu1 %897  ;;  %v900_v0 = vpop.xlane.xlu0 %899 }
 0x240   : > { %2681 = vrsqrt.f32 %v940_v59  ;;  %v926_v1 = vmul.f32 0.03125, %v898_v63  ;;  %v927_v2 = vmul.f32 0.03125, %v900_v0 }
 0x241   : > { %2683 = vrsqrt.f32 %v941_v60 }
 0x242   : > { %v942_v9 = vadd.f32 1e-05, %v926_v1  ;;  %v943_v11 = vadd.f32 1e-05, %v927_v2 }
 0x243   : > { %v902_v12 = vpop.xlane.xlu1 %901  ;;  %v904_v13 = vpop.xlane.xlu0 %903 }
 0x244   : > { %2685 = vrsqrt.f32 %v942_v9  ;;  %v928_v3 = vmul.f32 0.03125, %v902_v12  ;;  %v929_v4 = vmul.f32 0.03125, %v904_v13 }
 0x245   : > { %2687 = vrsqrt.f32 %v943_v11 }
 0x246   : > { %v2680_v16 = vpop.eup %2679  ;;  %v944_v17 = vadd.f32 1e-05, %v928_v3  ;;  %v945_v18 = vadd.f32 1e-05, %v929_v4 }
 0x247   : > { %v3203_v19 = vmul.f32 %v2680_v16, %v3094_v21  ;;  %v906_v20 = vpop.xlane.xlu1 %905  ;;  %v908_v23 = vpop.xlane.xlu0 %907 }
 0x248   : > { %2689 = vrsqrt.f32 %v944_v17  ;;  %v930_v5 = vmul.f32 0.03125, %v906_v20  ;;  %v931_v6 = vmul.f32 0.03125, %v908_v23 }
 0x249   : > { %v2208_v26 = vmul.f32 -1.442695, %v3203_v19  ;;  %2691 = vrsqrt.f32 %v945_v18 }
 0x24a   : > { %v2682_v27 = vpop.eup %2681  ;;  %v946_v30 = vadd.f32 1e-05, %v930_v5  ;;  %v947_v7 = vadd.f32 1e-05, %v931_v6 }
 0x24b   : > { %v2684_v8 = vpop.eup %2683  ;;  %2693 = vpow2.f32 %v2208_v26  ;;  %v3207_v33 = vmul.f32 %v2682_v27, %v3106_v31  ;;  %v910_v10 = vpop.xlane.xlu1 %909 }
 0x24c   : > { %v912_v34 = vpop.xlane.xlu0 %911  ;;  %v3210_v21 = vmul.f32 %v2684_v8, %v3098_v22  ;;  %2695 = vrsqrt.f32 %v946_v30  ;;  %v932_v35 = vmul.f32 0.03125, %v910_v10 }
 0x24d   : > { %v933_v36 = vmul.f32 0.03125, %v912_v34  ;;  %v2209_v37 = vmul.f32 -1.442695, %v3207_v33  ;;  %2697 = vrsqrt.f32 %v947_v7 }
 0x24e   : > { %v2686_v38 = vpop.eup %2685  ;;  %v2210_v39 = vmul.f32 -1.442695, %v3210_v21  ;;  %v948_v40 = vadd.f32 1e-05, %v932_v35 }
 0x24f   : > { %v949_v43 = vadd.f32 1e-05, %v933_v36  ;;  %v2688_v44 = vpop.eup %2687  ;;  %2699 = vpow2.f32 %v2209_v37  ;;  %v3215_v31 = vmul.f32 %v2686_v38, %v3110_v32  ;;  %v914_v45 = vpop.xlane.xlu1 %913 }
 0x250   : > { %v916_v46 = vpop.xlane.xlu0 %915  ;;  %2701 = vpow2.f32 %v2210_v39  ;;  %v3218_v22 = vmul.f32 %v2688_v44, %v3118_v41  ;;  %v934_v47 = vmul.f32 0.03125, %v914_v45 }
 0x251   : > { %v935_v48 = vmul.f32 0.03125, %v916_v46  ;;  %v2211_v49 = vmul.f32 -1.442695, %v3215_v31  ;;  %2703 = vrsqrt.f32 %v948_v40 }
 0x252   : > { %v2690_v50 = vpop.eup %2689  ;;  %v2212_v53 = vmul.f32 -1.442695, %v3218_v22  ;;  %2705 = vrsqrt.f32 %v949_v43  ;;  %v950_v54 = vadd.f32 1e-05, %v934_v47 }
 0x253   : > { %v951_v55 = vadd.f32 1e-05, %v935_v48  ;;  %v2692_v56 = vpop.eup %2691  ;;  %2707 = vpow2.f32 %v2211_v49  ;;  %v3223_v32 = vmul.f32 %v2690_v50, %v3122_v42  ;;  %v918_v57 = vpop.xlane.xlu1 %917 }
 0x254   : > { %2709 = vpow2.f32 %v2212_v53  ;;  %v3226_v41 = vmul.f32 %v2692_v56, %v3132_v51  ;;  %v936_v58 = vmul.f32 0.03125, %v918_v57  ;;  %v920_v59 = vpop.xlane.xlu0 %919 }
 0x255   : > { %v2694_v60 = vpop.eup %2693  ;;  %v2213_v63 = vmul.f32 -1.442695, %v3223_v32  ;;  %2711 = vrsqrt.f32 %v950_v54  ;;  %v937_v12 = vmul.f32 0.03125, %v920_v59 }
 0x256   : > { %v2696_v0 = vpop.eup %2695  ;;  %v1035_v1 = vadd.f32 1.0, %v2694_v60  ;;  %v2214_v2 = vmul.f32 -1.442695, %v3226_v41  ;;  %2713 = vrsqrt.f32 %v951_v55  ;;  %v952_v9 = vadd.f32 1e-05, %v936_v58 }
 0x257   : > { %v2698_v11 = vpop.eup %2697  ;;  %2715 = vpow2.f32 %v2213_v63  ;;  %v3231_v42 = vmul.f32 %v2696_v0, %v3136_v52  ;;  %v953_v23 = vadd.f32 1e-05, %v937_v12  ;;  %v922_v34 = vpop.xlane.xlu1 %921 }
 0x258   : > { %2717 = vrcp.f32 %v1035_v1  ;;  %v3234_v51 = vmul.f32 %v2698_v11, %v3146_v61  ;;  %v938_v40 = vmul.f32 0.03125, %v922_v34 }
 0x259   : > { %v2700_v13 = vpop.eup %2699  ;;  %2719 = vpow2.f32 %v2214_v2  ;;  %v2215_v3 = vmul.f32 -1.442695, %v3231_v42 }
 0x25a   : > { %v2702_v4 = vpop.eup %2701  ;;  %v1036_v16 = vadd.f32 1.0, %v2700_v13  ;;  %v2216_v17 = vmul.f32 -1.442695, %v3234_v51  ;;  %2721 = vrsqrt.f32 %v952_v9  ;;  %v954_v49 = vadd.f32 1e-05, %v938_v40 }
 0x25b   : > { %v2704_v18 = vpop.eup %2703  ;;  %v1037_v20 = vadd.f32 1.0, %v2702_v4  ;;  %2723 = vpow2.f32 %v2215_v3 }
 0x25c   : > { %v2706_v52 = vpop.eup %2705  ;;  %2725 = vrcp.f32 %v1036_v16  ;;  %v3239_v5 = vmul.f32 %v2704_v18, %v3150_v62 }
 0x25d   : > { %v2708_v61 = vpop.eup %2707  ;;  %2727 = vrcp.f32 %v1037_v20  ;;  %v3242_v6 = vmul.f32 %v2706_v52, %v3160_v14  ;;  %v1120_v20 = vld [vmem:[#allocation3 + $0x28] sm:$0xff] }
 0x25e   : > { %v2710_v26 = vpop.eup %2709  ;;  %v1038_v27 = vadd.f32 1.0, %v2708_v61  ;;  %2729 = vpow2.f32 %v2216_v17  ;;  %v2217_v30 = vmul.f32 -1.442695, %v3239_v5 }
 0x25f   : > { %v2712_v7 = vpop.eup %2711  ;;  %v1039_v8 = vadd.f32 1.0, %v2710_v26  ;;  %v2218_v10 = vmul.f32 -1.442695, %v3242_v6  ;;  %2731 = vrsqrt.f32 %v953_v23 }
 0x260   : > { %v2714_v35 = vpop.eup %2713  ;;  %2733 = vrcp.f32 %v1038_v27  ;;  %v3247_v62 = vmul.f32 %v2712_v7, %v3164_v15 }
 0x261   : > { %v2716_v36 = vpop.eup %2715  ;;  %2735 = vrcp.f32 %v1039_v8  ;;  %v3250_v14 = vmul.f32 %v2714_v35, %v3174_v24  ;;  %v1122_v35 = vld [vmem:[#allocation3 + $0x38] sm:$0xff] }
 0x262   : > { %v2718_v37 = vpop.eup %2717  ;;  %v1040_v38 = vadd.f32 1.0, %v2716_v36  ;;  %2737 = vpow2.f32 %v2217_v30  ;;  %v2219_v39 = vmul.f32 -1.442695, %v3247_v62 }
 0x263   : > { %v2720_v43 = vpop.eup %2719  ;;  %2739 = vpow2.f32 %v2218_v10  ;;  %v2220_v44 = vmul.f32 -1.442695, %v3250_v14  ;;  %v1083_v53 = vmul.f32 %v2718_v37, %v3203_v19 }
 0x264   : > { %v2722_v45 = vpop.eup %2721  ;;  %2741 = vrcp.f32 %v1040_v38  ;;  %v1041_v46 = vadd.f32 1.0, %v2720_v43 }
 0x265   : > { %v2724_v15 = vpop.eup %2723  ;;  %2743 = vpow2.f32 %v2219_v39  ;;  %v3255_v47 = vmul.f32 %v2722_v45, %v3178_v25  ;;  %v1118_v25 = vld [vmem:[#allocation3 + $0x18] sm:$0xff] }
 0x266   : > { %v2726_v24 = vpop.eup %2725  ;;  %2745 = vrcp.f32 %v1041_v46  ;;  %v1042_v48 = vadd.f32 1.0, %v2724_v15 }
 0x267   : > { %v2728_v50 = vpop.eup %2727  ;;  %v1084_v54 = vmul.f32 %v2726_v24, %v3207_v33  ;;  %2747 = vpow2.f32 %v2220_v44  ;;  %v2221_v55 = vmul.f32 -1.442695, %v3255_v47 }
 0x268   : > { %v2730_v56 = vpop.eup %2729  ;;  %2749 = vrcp.f32 %v1042_v48  ;;  %v1085_v0 = vmul.f32 %v2728_v50, %v3210_v21 }
 0x269   : > { %v2732_v57 = vpop.eup %2731  ;;  %v1099_v58 = vpack.c.bf16 %v1084_v54, %v1083_v53  ;;  %v1043_v59 = vadd.f32 1.0, %v2730_v56  ;;  %2751 = vpow2.f32 %v2221_v55  ;;  %v2663_v56 = vld [vmem:[%s1489_s14] sm:$0xff]  }
 0x26a   : > { %v2734_v60 = vpop.eup %2733  ;;  %2753 = vrsqrt.f32 %v954_v49  ;;  %v3263_v19 = vmul.f32 %v2732_v57, %v3188_v28  ;;  %2455 = vmatprep.subr.bf16.mxu1 %v2663_v56  ;;  %v2664_v57 = vld [vmem:[%s1489_s14 + $0x8] sm:$0xff]  }
 0x26b   : > { %v2736_v63 = vpop.eup %2735  ;;  %v1086_v1 = vmul.f32 %v2734_v60, %v3215_v31  ;;  %1303 = vmatmul.mubr.bf16.vlgmr.msra.gmra.mrb[0].mxu0 %v1099_v58  ;;  %2755 = vrcp.f32 %v1043_v59  ;;  %2456 = vmatpush3.bf16.msra.mxu1 %v2663_v56  ;;  %v2665_v58 = vld [vmem:[%s1489_s14 + $0x10] sm:$0xff]   ;;  %v2666_v59 = vld [vmem:[%s1489_s14 + $0x18] sm:$0xff]   ;;  %v2668_v60 = vld [vmem:[%s1489_s14 + $0x28] sm:$0xff]  }
 0x26c   : > { %v2738_v33 = vpop.eup %2737  ;;  %1310 = vmatprep.mubr.bf16.mxu0 %v1118_v25  ;;  %v1087_v4 = vmul.f32 %v2736_v63, %v3218_v22  ;;  %v2222_v21 = vmul.f32 -1.442695, %v3263_v19  ;;  %2457 = vmatprep.subr.bf16.mxu1 %v2664_v57  ;;  %v2667_v25 = vld [vmem:[%s1489_s14 + $0x20] sm:$0xff]   ;;  %v2669_v63 = vld [vmem:[%s1489_s14 + $0x30] sm:$0xff]  }
 0x26d   : > { %v2740_v2 = vpop.eup %2739  ;;  %v1100_v9 = vpack.c.bf16 %v1086_v1, %v1085_v0  ;;  %v1044_v11 = vadd.f32 1.0, %v2738_v33  ;;  %v2670_v0 = vld [vmem:[%s1489_s14 + $0x38] sm:$0xff]   ;;  %v3288_v1 = vld [vmem:[%s3285_s16] sm:$0xff]   ;;  %s1846_s14 = scalar_lea.vmem %s3507_s9, %s2885_s21 }
 0x26e   : > { %v2742_v12 = vpop.eup %2741  ;;  %v1045_v13 = vadd.f32 1.0, %v2740_v2  ;;  %v3295_v33 = vld [vmem:[%s1166_s17] ss:$0 sm:$0xff] }
 0x26f   : > { %v2744_v3 = vpop.eup %2743  ;;  %v1088_v16 = vmul.f32 %v2742_v12, %v3223_v32  ;;  %2757 = vrcp.f32 %v1044_v11  ;;  %2458 = vmatpush3.bf16.msra.mxu1 %v2664_v57 }
 0x270   : > { %v2746_v31 = vpop.eup %2745  ;;  %2759 = vrcp.f32 %v1045_v13  ;;  %v1046_v28 = vadd.f32 1.0, %v2744_v3  ;;  %2459 = vmatprep.subr.bf16.mxu1 %v2665_v58 }
 0x271   : > { %v2748_v17 = vpop.eup %2747  ;;  %v1101_v18 = vpack.c.bf16 %v1088_v16, %v1087_v4  ;;  %v1089_v26 = vmul.f32 %v2746_v31, %v3226_v41 }
 0x272   : > { %v2750_v23 = vpop.eup %2749  ;;  %2761 = vrcp.f32 %v1046_v28  ;;  %v1047_v52 = vadd.f32 1.0, %v2748_v17 }
 0x273   : > { %v2752_v61 = vpop.eup %2751  ;;  %v1090_v27 = vmul.f32 %v2750_v23, %v3231_v42  ;;  %2763 = vpow2.f32 %v2222_v21  ;;  %1311 = vmatmul.mubr.bf16.gmra.mrb[4].mxu0 %v1100_v9  ;;  %2460 = vmatpush3.bf16.msra.mxu1 %v2665_v58 }
 0x274   : > { %v2754_v22 = vpop.eup %2753  ;;  %2765 = vrcp.f32 %v1047_v52  ;;  %v1048_v32 = vadd.f32 1.0, %v2752_v61  ;;  %1318 = vmatprep.mubr.bf16.mxu0 %v1120_v20  ;;  %2461 = vmatprep.subr.bf16.mxu1 %v2666_v59 }
 0x275   : > { %v1102_v30 = vpack.c.bf16 %v1090_v27, %v1089_v26  ;;  %v986_v7 = vmul.f32 %v2754_v22, %v3192_v29  ;;  %v2756_v8 = vpop.eup %2755 }
 0x276   : > { %2767 = vrcp.f32 %v1048_v32  ;;  %v1091_v41 = vmul.f32 %v2756_v8, %v3234_v51  ;;  %v1124_v51 = vld [vmem:[#allocation3 + $0x48] sm:$0xff] }
 0x277   : > { %v2223_v10 = vmul.f32 -1.442695, %v986_v7  ;;  %2462 = vmatpush3.bf16.msra.mxu1 %v2666_v59 }
 0x278   : > { %2463 = vmatprep.subr.bf16.mxu1 %v2667_v25 }
 0x279   : > { %v2758_v34 = vpop.eup %2757  ;;  %2769 = vpow2.f32 %v2223_v10 }
 0x27a   : > { %v2760_v36 = vpop.eup %2759  ;;  %v1092_v42 = vmul.f32 %v2758_v34, %v3239_v5 }
 0x27b   : > { %1319 = vmatmul.mubr.bf16.gmra.mrb[8].mxu0 %v1101_v18  ;;  %v1093_v40 = vmul.f32 %v2760_v36, %v3242_v6  ;;  %v1126_v6 = vld [vmem:[#allocation3 + $0x58] sm:$0xff]  ;;  %2464 = vmatpush3.bf16.msra.mxu1 %v2667_v25 }
 0x27c   : > { %v2762_v37 = vpop.eup %2761  ;;  %v1103_v38 = vpack.c.bf16 %v1092_v42, %v1091_v41  ;;  %1326 = vmatprep.mubr.bf16.mxu0 %v1122_v35  ;;  %2465 = vmatprep.subr.bf16.mxu1 %v2668_v60 }
 0x27d   : > { %v2764_v39 = vpop.eup %2763  ;;  %v1094_v29 = vmul.f32 %v2762_v37, %v3247_v62 }
 0x27e   : > { %v2766_v43 = vpop.eup %2765  ;;  %v1049_v46 = vadd.f32 1.0, %v2764_v39 }
 0x27f   : > { %v1104_v44 = vpack.c.bf16 %v1094_v29, %v1093_v40  ;;  %v1095_v15 = vmul.f32 %v2766_v43, %v3250_v14  ;;  %v1128_v14 = vld [vmem:[#allocation3 + $0x68] sm:$0xff]  ;;  %2466 = vmatpush3.bf16.msra.mxu1 %v2668_v60 }
 0x280   : > { %v2768_v45 = vpop.eup %2767  ;;  %2771 = vrcp.f32 %v1049_v46  ;;  %2467 = vmatprep.subr.bf16.mxu1 %v2669_v63 }
 0x281   : > { %v1096_v24 = vmul.f32 %v2768_v45, %v3255_v47  ;;  %v1130_v47 = vld [vmem:[#allocation3 + $0x78] sm:$0xff] }
 0x283   : > { %v2770_v48 = vpop.eup %2769  ;;  %v1105_v5 = vpack.c.bf16 %v1096_v24, %v1095_v15  ;;  %1327 = vmatmul.mubr.bf16.gmra.mrb[12].mxu0 %v1102_v30  ;;  %2468 = vmatpush3.bf16.msra.mxu1 %v2669_v63 }
 0x284   : > { %v1050_v49 = vadd.f32 1.0, %v2770_v48  ;;  %1334 = vmatprep.mubr.bf16.mxu0 %v1124_v51  ;;  %2469 = vmatprep.subr.bf16.mxu1 %v2670_v0 }
 0x286   : > { %2773 = vrcp.f32 %v1050_v49 }
 0x287   : > { %2470 = vmatpush3.bf16.msra.mxu1 %v2670_v0 }
 0x288   : > { %2487 = vmatprep.subr.bf16.mxu1 %v3288_v1 }
 0x28a   : > { %v2772_v62 = vpop.eup %2771 }
 0x28b   : > { %1335 = vmatmul.mubr.bf16.gmra.mrb[16].mxu0 %v1103_v38  ;;  %v1097_v53 = vmul.f32 %v2772_v62, %v3263_v19 }
 0x28c   : > { %1342 = vmatprep.mubr.bf16.mxu0 %v1126_v6 }
 0x290   : > { %v2774_v50 = vpop.eup %2773 }
 0x291   : > { %v1098_v54 = vmul.f32 %v2774_v50, %v986_v7 }
 0x293   : > { %v1106_v55 = vpack.c.bf16 %v1098_v54, %v1097_v53  ;;  %1343 = vmatmul.mubr.bf16.gmra.mrb[20].mxu0 %v1104_v44 }
 0x294   : > { %1350 = vmatprep.mubr.bf16.mxu0 %v1128_v14 }
 0x29b   : > { %1351 = vmatmul.mubr.bf16.gmra.mrb[24].mxu0 %v1105_v5 }
 0x29c   : > { %1358 = vmatprep.mubr.bf16.mxu0 %v1130_v47 }
 0x2a3   : > { %1359 = vmatmul.mubr.bf16.gmra.mrb[28].mxu0 %v1106_v55 }
 0x33e   : > { %v2327_v19 = vpop.f32.mrb[0].mxu0 }
 0x33f   : > { %v2328_v2 = vpop.f32.mrb[1].mxu0 }
 0x340   : > { %v2329_v9 = vadd.f32 %v2328_v2, %v2327_v19  ;;  %v2330_v11 = vpop.f32.mrb[2].mxu0 }
 0x341   : > { %v2331_v12 = vpop.f32.mrb[3].mxu0 }
 0x342   : > { %v1305_v13 = vadd.f32 %v2329_v9, %v3295_v33  ;;  %v2332_v3 = vadd.f32 %v2331_v12, %v2330_v11 }
 0x344   : > { %v2243_v4 = vmul.f32 -1.442695, %v1305_v13  ;;  %v1308_v16 = vadd.f32 %v2332_v3, %v3295_v33 }
 0x346   : > { %2775 = vpow2.f32 %v2243_v4  ;;  %v2244_v21 = vmul.f32 -1.442695, %v1308_v16  ;;  %v2333_v31 = vpop.f32.mrb[4].mxu0 }
 0x347   : > { %v2334_v28 = vpop.f32.mrb[5].mxu0 }
 0x348   : > { %2777 = vpow2.f32 %v2244_v21  ;;  %v2335_v17 = vadd.f32 %v2334_v28, %v2333_v31  ;;  %v2336_v18 = vpop.f32.mrb[6].mxu0 }
 0x349   : > { %v2337_v20 = vpop.f32.mrb[7].mxu0 }
 0x34a   : > { %v3300_v23 = vadd.f32 %v2335_v17, %v3295_v33  ;;  %v2338_v52 = vadd.f32 %v2337_v20, %v2336_v18 }
 0x34c   : > { %v2245_v61 = vmul.f32 -1.442695, %v3300_v23  ;;  %v3304_v26 = vadd.f32 %v2338_v52, %v3295_v33 }
 0x34e   : > { %2779 = vpow2.f32 %v2245_v61  ;;  %v2246_v27 = vmul.f32 -1.442695, %v3304_v26  ;;  %v2339_v22 = vpop.f32.mrb[8].mxu0 }
 0x34f   : > { %v2340_v32 = vpop.f32.mrb[9].mxu0 }
 0x350   : > { %v2776_v30 = vpop.eup %2775  ;;  %2781 = vpow2.f32 %v2246_v27  ;;  %v2341_v7 = vadd.f32 %v2340_v32, %v2339_v22  ;;  %v2342_v8 = vpop.f32.mrb[10].mxu0 }
 0x351   : > { %v1415_v10 = vadd.f32 1.0, %v2776_v30  ;;  %v2343_v34 = vpop.f32.mrb[11].mxu0  ;;  %v2672_v30 = vld [vmem:[%s3285_s16 + $0x8] sm:$0xff]  }
 0x352   : > { %v2778_v35 = vpop.eup %2777  ;;  %v3308_v36 = vadd.f32 %v2341_v7, %v3295_v33  ;;  %v2344_v41 = vadd.f32 %v2343_v34, %v2342_v8 }
 0x353   : > { %2783 = vrcp.f32 %v1415_v10  ;;  %v1416_v42 = vadd.f32 1.0, %v2778_v35  ;;  %v2673_v35 = vld [vmem:[%s3285_s16 + $0x10] sm:$0xff]  }
 0x354   : > { %v2247_v37 = vmul.f32 -1.442695, %v3308_v36  ;;  %v3312_v38 = vadd.f32 %v2344_v41, %v3295_v33 }
 0x355   : > { %2785 = vrcp.f32 %v1416_v42 }
 0x356   : > { %2787 = vpow2.f32 %v2247_v37  ;;  %v2248_v39 = vmul.f32 -1.442695, %v3312_v38  ;;  %v2345_v40 = vpop.f32.mrb[12].mxu0 }
 0x357   : > { %v2346_v29 = vpop.f32.mrb[13].mxu0 }
 0x358   : > { %v2780_v43 = vpop.eup %2779  ;;  %2789 = vpow2.f32 %v2248_v39  ;;  %v2347_v44 = vadd.f32 %v2346_v29, %v2345_v40  ;;  %v2348_v45 = vpop.f32.mrb[14].mxu0 }
 0x359   : > { %v1417_v46 = vadd.f32 1.0, %v2780_v43  ;;  %v2349_v15 = vpop.f32.mrb[15].mxu0 }
 0x35a   : > { %v2782_v24 = vpop.eup %2781  ;;  %v3316_v51 = vadd.f32 %v2347_v44, %v3295_v33  ;;  %v2350_v48 = vadd.f32 %v2349_v15, %v2348_v45 }
 0x35b   : > { %2791 = vrcp.f32 %v1417_v46  ;;  %v1418_v5 = vadd.f32 1.0, %v2782_v24 }
 0x35c   : > { %v2249_v49 = vmul.f32 -1.442695, %v3316_v51  ;;  %v3320_v6 = vadd.f32 %v2350_v48, %v3295_v33  ;;  %v2674_v48 = vld [vmem:[%s3285_s16 + $0x18] sm:$0xff]  }
 0x35d   : > { %v2784_v62 = vpop.eup %2783  ;;  %2793 = vrcp.f32 %v1418_v5 }
 0x35e   : > { %2795 = vpow2.f32 %v2249_v49  ;;  %v2250_v50 = vmul.f32 -1.442695, %v3320_v6  ;;  %v2351_v53 = vpop.f32.mrb[16].mxu0  ;;  %v1463_v57 = vmul.f32 %v2784_v62, %v1305_v13 }
 0x35f   : > { %v2786_v54 = vpop.eup %2785  ;;  %v2352_v14 = vpop.f32.mrb[17].mxu0 }
 0x360   : > { %v2788_v55 = vpop.eup %2787  ;;  %2797 = vpow2.f32 %v2250_v50  ;;  %v2353_v47 = vadd.f32 %v2352_v14, %v2351_v53  ;;  %v2354_v56 = vpop.f32.mrb[18].mxu0  ;;  %v1464_v58 = vmul.f32 %v2786_v54, %v1308_v16  ;;  %v2675_v53 = vld [vmem:[%s3285_s16 + $0x20] sm:$0xff]  }
 0x361   : > { %v1419_v59 = vadd.f32 1.0, %v2788_v55  ;;  %v2355_v25 = vpop.f32.mrb[19].mxu0 }
 0x362   : > { %v2790_v60 = vpop.eup %2789  ;;  %v3324_v63 = vadd.f32 %v2353_v47, %v3295_v33  ;;  %v2356_v0 = vadd.f32 %v2355_v25, %v2354_v56  ;;  %v1479_v19 = vpack.c.bf16 %v1464_v58, %v1463_v57 }
 0x363   : > { %2799 = vrcp.f32 %v1419_v59  ;;  %v1420_v2 = vadd.f32 1.0, %v2790_v60 }
 0x364   : > { %v2251_v9 = vmul.f32 -1.442695, %v3324_v63  ;;  %v3328_v11 = vadd.f32 %v2356_v0, %v3295_v33  ;;  %2471 = vmatprep.mubr.bf16.mxu1 %v1479_v19 }
 0x365   : > { %v2792_v12 = vpop.eup %2791  ;;  %2801 = vrcp.f32 %v1420_v2 }
 0x366   : > { %2803 = vpow2.f32 %v2251_v9  ;;  %v2252_v13 = vmul.f32 -1.442695, %v3328_v11  ;;  %v2357_v3 = vpop.f32.mrb[20].mxu0  ;;  %v1465_v31 = vmul.f32 %v2792_v12, %v3300_v23  ;;  %v2676_v9 = vld [vmem:[%s3285_s16 + $0x28] sm:$0xff]  }
 0x367   : > { %v2794_v4 = vpop.eup %2793  ;;  %v2358_v16 = vpop.f32.mrb[21].mxu0 }
 0x368   : > { %v2796_v21 = vpop.eup %2795  ;;  %v1466_v28 = vmul.f32 %v2794_v4, %v3304_v26  ;;  %2805 = vpow2.f32 %v2252_v13  ;;  %v2359_v17 = vadd.f32 %v2358_v16, %v2357_v3  ;;  %v2360_v18 = vpop.f32.mrb[22].mxu0 }
 0x369   : > { %v1421_v20 = vadd.f32 1.0, %v2796_v21  ;;  %v2361_v52 = vpop.f32.mrb[23].mxu0 }
 0x36a   : > { %v2798_v61 = vpop.eup %2797  ;;  %v3334_v27 = vadd.f32 %v2359_v17, %v3295_v33  ;;  %v2362_v22 = vadd.f32 %v2361_v52, %v2360_v18  ;;  %v1480_v32 = vpack.c.bf16 %v1466_v28, %v1465_v31 }
 0x36b   : > { %2807 = vrcp.f32 %v1421_v20  ;;  %v1422_v7 = vadd.f32 1.0, %v2798_v61 }
 0x36c   : > { %v2253_v8 = vmul.f32 -1.442695, %v3334_v27  ;;  %v3339_v23 = vadd.f32 %v2362_v22, %v3295_v33  ;;  %2472 = vmatmul.mubr.bf16.vlgmr.msra.gmra.mrb[0].mxu1 %v1480_v32 }
 0x36d   : > { %v2800_v26 = vpop.eup %2799  ;;  %2809 = vrcp.f32 %v1422_v7  ;;  %2488 = vmatpush3.bf16.msra.mxu1 %v3288_v1 }
 0x36e   : > { %2811 = vpow2.f32 %v2253_v8  ;;  %v2254_v10 = vmul.f32 -1.442695, %v3339_v23  ;;  %v2363_v34 = vpop.f32.mrb[24].mxu0  ;;  %2489 = vmatprep.subr.bf16.mxu1 %v2672_v30  ;;  %v1467_v39 = vmul.f32 %v2800_v26, %v3308_v36 }
 0x36f   : > { %v2802_v41 = vpop.eup %2801  ;;  %v2364_v42 = vpop.f32.mrb[25].mxu0 }
 0x370   : > { %v2804_v37 = vpop.eup %2803  ;;  %v1468_v40 = vmul.f32 %v2802_v41, %v3312_v38  ;;  %2813 = vpow2.f32 %v2254_v10  ;;  %v2365_v29 = vadd.f32 %v2364_v42, %v2363_v34  ;;  %v2366_v43 = vpop.f32.mrb[26].mxu0 }
 0x371   : > { %v1423_v44 = vadd.f32 1.0, %v2804_v37  ;;  %v2367_v45 = vpop.f32.mrb[27].mxu0  ;;  %2490 = vmatpush3.bf16.msra.mxu1 %v2672_v30 }
 0x372   : > { %v2806_v1 = vpop.eup %2805  ;;  %v3347_v46 = vadd.f32 %v2365_v29, %v3295_v33  ;;  %v2368_v15 = vadd.f32 %v2367_v45, %v2366_v43  ;;  %v1481_v24 = vpack.c.bf16 %v1468_v40, %v1467_v39  ;;  %2491 = vmatprep.subr.bf16.mxu1 %v2673_v35  ;;  %v2677_v39 = vld [vmem:[%s3285_s16 + $0x30] sm:$0xff]   ;;  %v2678_v40 = vld [vmem:[%s3285_s16 + $0x38] sm:$0xff]   ;;  %v2261_v43 = vld [vmem:[%s1506_s22] ss:$0 sm:$0xff] }
 0x373   : > { %2815 = vrcp.f32 %v1423_v44  ;;  %v1424_v5 = vadd.f32 1.0, %v2806_v1 }
 0x374   : > { %v2255_v36 = vmul.f32 -1.442695, %v3347_v46  ;;  %v3352_v38 = vadd.f32 %v2368_v15, %v3295_v33  ;;  %2475 = vmatprep.mubr.bf16.mxu1 %v1481_v24 }
 0x375   : > { %v2808_v49 = vpop.eup %2807  ;;  %2817 = vrcp.f32 %v1424_v5  ;;  %2492 = vmatpush3.bf16.msra.mxu1 %v2673_v35 }
 0x376   : > { %2819 = vpow2.f32 %v2255_v36  ;;  %v2256_v62 = vmul.f32 -1.442695, %v3352_v38  ;;  %v2369_v50 = vpop.f32.mrb[28].mxu0  ;;  %2493 = vmatprep.subr.bf16.mxu1 %v2674_v48  ;;  %v1469_v47 = vmul.f32 %v2808_v49, %v3316_v51 }
 0x377   : > { %v2810_v54 = vpop.eup %2809  ;;  %v2370_v14 = vpop.f32.mrb[29].mxu0 }
 0x378   : > { %v2812_v55 = vpop.eup %2811  ;;  %v1470_v56 = vmul.f32 %v2810_v54, %v3320_v6  ;;  %2821 = vpow2.f32 %v2256_v62  ;;  %v2371_v57 = vadd.f32 %v2370_v14, %v2369_v50  ;;  %v2372_v58 = vpop.f32.mrb[30].mxu0 }
 0x379   : > { %v1425_v59 = vadd.f32 1.0, %v2812_v55  ;;  %v2373_v25 = vpop.f32.mrb[31].mxu0  ;;  %2494 = vmatpush3.bf16.msra.mxu1 %v2674_v48 }
 0x37a   : > { %v2814_v60 = vpop.eup %2813  ;;  %v1361_v0 = vadd.f32 %v2371_v57, %v3295_v33  ;;  %v2374_v19 = vadd.f32 %v2373_v25, %v2372_v58  ;;  %v1482_v2 = vpack.c.bf16 %v1470_v56, %v1469_v47  ;;  %2495 = vmatprep.subr.bf16.mxu1 %v2675_v53 }
 0x37b   : > { %2823 = vrcp.f32 %v1425_v59  ;;  %v1426_v12 = vadd.f32 1.0, %v2814_v60 }
 0x37c   : > { %v2257_v13 = vmul.f32 -1.442695, %v1361_v0  ;;  %v1364_v51 = vadd.f32 %v2374_v19, %v3295_v33  ;;  %2476 = vmatmul.mubr.bf16.gmra.mrb[4].mxu1 %v1482_v2 }
 0x37d   : > { %v2816_v6 = vpop.eup %2815  ;;  %2825 = vrcp.f32 %v1426_v12  ;;  %2496 = vmatpush3.bf16.msra.mxu1 %v2675_v53 }
 0x37e   : > { %2827 = vpow2.f32 %v2257_v13  ;;  %v2258_v3 = vmul.f32 -1.442695, %v1364_v51  ;;  %2497 = vmatprep.subr.bf16.mxu1 %v2676_v9  ;;  %v1471_v21 = vmul.f32 %v2816_v6, %v3324_v63 }
 0x37f   : > { %v2818_v4 = vpop.eup %2817 }
 0x380   : > { %v2820_v16 = vpop.eup %2819  ;;  %v1472_v31 = vmul.f32 %v2818_v4, %v3328_v11  ;;  %2829 = vpow2.f32 %v2258_v3 }
 0x381   : > { %v1427_v28 = vadd.f32 1.0, %v2820_v16  ;;  %2498 = vmatpush3.bf16.msra.mxu1 %v2676_v9 }
 0x382   : > { %v2822_v17 = vpop.eup %2821  ;;  %v1483_v18 = vpack.c.bf16 %v1472_v31, %v1471_v21  ;;  %2499 = vmatprep.subr.bf16.mxu1 %v2677_v39 }
 0x383   : > { %2831 = vrcp.f32 %v1427_v28  ;;  %v1428_v33 = vadd.f32 1.0, %v2822_v17 }
 0x384   : > { %2479 = vmatprep.mubr.bf16.mxu1 %v1483_v18 }
 0x385   : > { %v2824_v20 = vpop.eup %2823  ;;  %2833 = vrcp.f32 %v1428_v33  ;;  %2500 = vmatpush3.bf16.msra.mxu1 %v2677_v39  ;;  %v3377_v33 = vld [vmem:[%s1846_s14] ss:$0 sm:$0xff] }
 0x386   : > { %v1473_v22 = vmul.f32 %v2824_v20, %v3334_v27  ;;  %2501 = vmatprep.subr.bf16.mxu1 %v2678_v40  ;;  %v2839_v20 = vld [vmem:[#allocation2 + $0x10] sm:$0xff]  ;;  %v2844_v39 = vld [vmem:[#allocation2 + $0x20] sm:$0xff] }
 0x387   : > { %v2826_v52 = vpop.eup %2825 }
 0x388   : > { %v2828_v61 = vpop.eup %2827  ;;  %v1474_v32 = vmul.f32 %v2826_v52, %v3339_v23 }
 0x389   : > { %v1429_v30 = vadd.f32 1.0, %v2828_v61  ;;  %2502 = vmatpush3.bf16.msra.mxu1 %v2678_v40 }
 0x38a   : > { %v2830_v63 = vpop.eup %2829  ;;  %v1484_v7 = vpack.c.bf16 %v1474_v32, %v1473_v22  ;;  %v2840_v22 = vld [vmem:[#allocation2] sm:$0xff] }
 0x38b   : > { %2835 = vrcp.f32 %v1429_v30  ;;  %v1430_v11 = vadd.f32 1.0, %v2830_v63 }
 0x38c   : > { %2480 = vmatmul.mubr.bf16.gmra.mrb[8].mxu1 %v1484_v7  ;;  %v2841_v7 = vld [vmem:[#allocation2 + $0x18] sm:$0xff] }
 0x38d   : > { %v2832_v8 = vpop.eup %2831  ;;  %2837 = vrcp.f32 %v1430_v11 }
 0x38e   : > { %v1475_v10 = vmul.f32 %v2832_v8, %v3347_v46 }
 0x38f   : > { %v2834_v26 = vpop.eup %2833 }
 0x390   : > { %v1476_v34 = vmul.f32 %v2834_v26, %v3352_v38 }
 0x392   : > { %v1485_v35 = vpack.c.bf16 %v1476_v34, %v1475_v10  ;;  %v2842_v10 = vld [vmem:[#allocation2 + $0x8] sm:$0xff] }
 0x394   : > { %2483 = vmatprep.mubr.bf16.mxu1 %v1485_v35 }
 0x395   : > { %v2836_v27 = vpop.eup %2835 }
 0x396   : > { %v1477_v41 = vmul.f32 %v2836_v27, %v1361_v0 }
 0x397   : > { %v2838_v23 = vpop.eup %2837 }
 0x398   : > { %v1478_v42 = vmul.f32 %v2838_v23, %v1364_v51 }
 0x39a   : > { %v1486_v37 = vpack.c.bf16 %v1478_v42, %v1477_v41  ;;  %v2843_v41 = vld [vmem:[#allocation2 + $0x30] sm:$0xff] }
 0x39c   : > { %2484 = vmatmul.mubr.bf16.gmra.mrb[12].mxu1 %v1486_v37 }
 0x43f   : > { %v2473_v29 = vpop.f32.mrb[0].mxu1 }
 0x440   : > { %v1596_v44 = vpop.f32.mrb[1].mxu1  ;;  %v1605_v1 = vadd.f32 %v2473_v29, %v2261_v43 }
 0x441   : > { %v2474_v45 = vpop.f32.mrb[2].mxu1  ;;  %v1597_v24 = vadd.f32 %v2261_v43, %v1596_v44  ;;  %v2845_v44 = vld [vmem:[#allocation2 + $0x38] sm:$0xff] }
 0x442   : > { %v1608_v46 = vadd.f32 %v2474_v45, %v2261_v43  ;;  %v1599_v15 = vpop.f32.mrb[3].mxu1 }
 0x443   : > { %v1600_v48 = vadd.f32 %v2261_v43, %v1599_v15  ;;  %v2846_v15 = vld [vmem:[#allocation2 + $0x28] sm:$0xff] }
 0x444   : > { %v1660_v5 = vpack.c.bf16 %v1608_v46, %v1605_v1 }
 0x445   : > { %v1659_v36 = vpack.c.bf16 %v1600_v48, %v1597_v24 }
 0x447   : > { %2503 = vmatprep.mubr.bf16.mxu1 %v1659_v36 }
 0x448   : > { %2504 = vmatmul.mubr.bf16.vlgmr.msra.gmra.mrb[16].mxu1 %v1660_v5 }
 0x44f   : > { %v2477_v38 = vpop.f32.mrb[4].mxu1 }
 0x450   : > { %v1612_v49 = vpop.f32.mrb[5].mxu1  ;;  %v1621_v50 = vadd.f32 %v2477_v38, %v2261_v43  ;;  %v2847_v38 = vld [vmem:[#allocation2 + $0x50] sm:$0xff] }
 0x451   : > { %v2478_v62 = vpop.f32.mrb[6].mxu1  ;;  %v1613_v14 = vadd.f32 %v2261_v43, %v1612_v49 }
 0x452   : > { %v1624_v53 = vadd.f32 %v2478_v62, %v2261_v43  ;;  %v1615_v54 = vpop.f32.mrb[7].mxu1 }
 0x453   : > { %v1616_v55 = vadd.f32 %v2261_v43, %v1615_v54 }
 0x454   : > { %v1662_v47 = vpack.c.bf16 %v1624_v53, %v1621_v50  ;;  %v2848_v50 = vld [vmem:[#allocation2 + $0x40] sm:$0xff] }
 0x455   : > { %v1661_v56 = vpack.c.bf16 %v1616_v55, %v1613_v14  ;;  %v2849_v55 = vld [vmem:[#allocation2 + $0x58] sm:$0xff] }
 0x457   : > { %2507 = vmatprep.mubr.bf16.mxu1 %v1661_v56 }
 0x458   : > { %2508 = vmatmul.mubr.bf16.gmra.mrb[20].mxu1 %v1662_v47 }
 0x45f   : > { %v2481_v57 = vpop.f32.mrb[8].mxu1 }
 0x460   : > { %v1628_v58 = vpop.f32.mrb[9].mxu1  ;;  %v1637_v25 = vadd.f32 %v2481_v57, %v2261_v43 }
 0x461   : > { %v2482_v59 = vpop.f32.mrb[10].mxu1  ;;  %v1629_v19 = vadd.f32 %v2261_v43, %v1628_v58  ;;  %v2850_v58 = vld [vmem:[#allocation2 + $0x48] sm:$0xff] }
 0x462   : > { %v1640_v60 = vadd.f32 %v2482_v59, %v2261_v43  ;;  %v1631_v0 = vpop.f32.mrb[11].mxu1 }
 0x463   : > { %v1632_v2 = vadd.f32 %v2261_v43, %v1631_v0 }
 0x464   : > { %v1664_v9 = vpack.c.bf16 %v1640_v60, %v1637_v25 }
 0x465   : > { %v1663_v12 = vpack.c.bf16 %v1632_v2, %v1629_v19  ;;  %v2851_v19 = vld [vmem:[#allocation2 + $0x70] sm:$0xff] }
 0x467   : > { %2511 = vmatprep.mubr.bf16.mxu1 %v1663_v12  ;;  %v2852_v12 = vld [vmem:[#allocation2 + $0x60] sm:$0xff] }
 0x468   : > { %2512 = vmatmul.mubr.bf16.gmra.mrb[24].mxu1 %v1664_v9 }
 0x46f   : > { %v2485_v13 = vpop.f32.mrb[12].mxu1 }
 0x470   : > { %v1644_v51 = vpop.f32.mrb[13].mxu1  ;;  %v1653_v3 = vadd.f32 %v2485_v13, %v2261_v43 }
 0x471   : > { %v2486_v6 = vpop.f32.mrb[14].mxu1  ;;  %v1645_v21 = vadd.f32 %v2261_v43, %v1644_v51 }
 0x472   : > { %v1656_v4 = vadd.f32 %v2486_v6, %v2261_v43  ;;  %v1647_v16 = vpop.f32.mrb[15].mxu1 }
 0x473   : > { %v1648_v31 = vadd.f32 %v2261_v43, %v1647_v16 }
 0x474   : > { %v1666_v28 = vpack.c.bf16 %v1656_v4, %v1653_v3  ;;  %v2853_v3 = vld [vmem:[#allocation2 + $0x78] sm:$0xff] }
 0x475   : > { %v1665_v17 = vpack.c.bf16 %v1648_v31, %v1645_v21  ;;  %v2854_v31 = vld [vmem:[#allocation2 + $0x68] sm:$0xff] }
 0x477   : > { %2515 = vmatprep.mubr.bf16.mxu1 %v1665_v17 }
 0x478   : > { %2516 = vmatmul.mubr.bf16.gmra.mrb[28].mxu1 %v1666_v28 }
 0x51b   : > { %v2505_v18 = vpop.f32.mrb[16].mxu1 }
 0x51c   : > { %v1832_v52 = vadd.f32 %v2839_v20, %v2505_v18  ;;  %v1767_v61 = vpop.f32.mrb[17].mxu1  ;;  %v2855_v20 = vld [vmem:[%s3508_s10] sm:$0xff] (!%p2280_p7)  }
 0x51d   : > { %v1830_v32 = vadd.f32 %v2840_v22, %v1767_v61  ;;  %v2506_v30 = vpop.f32.mrb[18].mxu1  ;;  %2519 = vmatprep.subr.bf16.mxu0 (!%p2280_p7), %v2855_v20  ;;  %2567 = vmatprep.subr.bf16.mxu1 (!%p2280_p7), %v2855_v20 }
 0x51e   : > { %v3380_v63 = vadd.f32 %v3377_v33, %v1832_v52  ;;  %v1833_v11 = vadd.f32 %v2841_v7, %v2506_v30  ;;  %v1770_v8 = vpop.f32.mrb[19].mxu1  ;;  %v2856_v52 = vld [vmem:[%s3508_s10 + $0x8] sm:$0xff] (!%p2280_p7)   ;;  %2520 = vmatpush3.bf16.msra.mxu0 (!%p2280_p7), %v2855_v20  ;;  %2575 = vmatpush3.bf16.msra.mxu1 (!%p2280_p7), %v2855_v20  ;;  %v2859_v30 = vld [vmem:[%s3508_s10 + $0x20] sm:$0xff] (!%p2280_p7)  }
 0x51f   : > { %v3383_v26 = vadd.f32 %v3377_v33, %v1830_v32  ;;  %v1831_v34 = vadd.f32 %v2842_v10, %v1770_v8  ;;  %2521 = vmatprep.subr.bf16.mxu0 (!%p2280_p7), %v2856_v52  ;;  %2568 = vmatprep.subr.bf16.mxu1 (!%p2280_p7), %v2856_v52  ;;  %v2858_v32 = vld [vmem:[%s3508_s10 + $0x18] sm:$0xff] (!%p2280_p7)   ;;  %v2860_v7 = vld [vmem:[%s3508_s10 + $0x28] sm:$0xff] (!%p2280_p7)  }
 0x520   : > { %1872 = vst [vmem:[#allocation2 + $0x10] sm:$0xff] %v3380_v63  ;;  %v3387_v35 = vadd.f32 %v3377_v33, %v1833_v11  ;;  %v2861_v11 = vld [vmem:[%s3508_s10 + $0x30] sm:$0xff] (!%p2280_p7)   ;;  %v2862_v8 = vld [vmem:[%s3508_s10 + $0x38] sm:$0xff] (!%p2280_p7)  }
 0x521   : > { %1870 = vst [vmem:[#allocation2] sm:$0xff] %v3383_v26  ;;  %v3391_v27 = vadd.f32 %v3377_v33, %v1831_v34 }
 0x522   : > { %1873 = vst [vmem:[#allocation2 + $0x18] sm:$0xff] %v3387_v35  ;;  %2522 = vmatpush3.bf16.msra.mxu0 (!%p2280_p7), %v2856_v52  ;;  %2576 = vmatpush3.bf16.msra.mxu1 (!%p2280_p7), %v2856_v52 }
 0x523   : > { %1871 = vst [vmem:[#allocation2 + $0x8] sm:$0xff] %v3391_v27  ;;  %v1890_v61 = vpack.c.bf16 (!%p2280_p7), %v3391_v27, %v3383_v26  ;;  %v1891_v26 = vpack.c.bf16 (!%p2280_p7), %v3387_v35, %v3380_v63  ;;  %v2281_v35 = vld [vmem:[%s3509_s11] ss:$0 sm:$0xff] (!%p2280_p7) }
 0x525   : > { %2535 = vmatprep.mubr.bf16.mxu0 (!%p2280_p7), %v1890_v61 }
 0x52b   : > { %v2509_v23 = vpop.f32.mrb[20].mxu1 }
 0x52c   : > { %v1836_v42 = vadd.f32 %v2843_v41, %v2509_v23  ;;  %v1783_v37 = vpop.f32.mrb[21].mxu1 }
 0x52d   : > { %v1834_v40 = vadd.f32 %v2844_v39, %v1783_v37  ;;  %v2510_v29 = vpop.f32.mrb[22].mxu1 }
 0x52e   : > { %v3396_v43 = vadd.f32 %v3377_v33, %v1836_v42  ;;  %v1837_v45 = vadd.f32 %v2845_v44, %v2510_v29  ;;  %v1786_v1 = vpop.f32.mrb[23].mxu1 }
 0x52f   : > { %v3399_v46 = vadd.f32 %v3377_v33, %v1834_v40  ;;  %v1835_v24 = vadd.f32 %v2846_v15, %v1786_v1 }
 0x530   : > { %1876 = vst [vmem:[#allocation2 + $0x30] sm:$0xff] %v3396_v43  ;;  %v3403_v48 = vadd.f32 %v3377_v33, %v1837_v45 }
 0x531   : > { %1874 = vst [vmem:[#allocation2 + $0x20] sm:$0xff] %v3399_v46  ;;  %v3407_v5 = vadd.f32 %v3377_v33, %v1835_v24 }
 0x532   : > { %1877 = vst [vmem:[#allocation2 + $0x38] sm:$0xff] %v3403_v48  ;;  %v1893_v23 = vpack.c.bf16 (!%p2280_p7), %v3403_v48, %v3396_v43 }
 0x533   : > { %1875 = vst [vmem:[#allocation2 + $0x28] sm:$0xff] %v3407_v5  ;;  %v1892_v34 = vpack.c.bf16 (!%p2280_p7), %v3407_v5, %v3399_v46 }
 0x53b   : > { %v2513_v36 = vpop.f32.mrb[24].mxu1 }
 0x53c   : > { %v1840_v49 = vadd.f32 %v2847_v38, %v2513_v36  ;;  %v1799_v62 = vpop.f32.mrb[25].mxu1 }
 0x53d   : > { %v1838_v53 = vadd.f32 %v2848_v50, %v1799_v62  ;;  %v2514_v54 = vpop.f32.mrb[26].mxu1 }
 0x53e   : > { %v3412_v14 = vadd.f32 %v3377_v33, %v1840_v49  ;;  %v1841_v47 = vadd.f32 %v2849_v55, %v2514_v54  ;;  %v1802_v56 = vpop.f32.mrb[27].mxu1 }
 0x53f   : > { %v1862_v57 = vadd.f32 %v3377_v33, %v1838_v53  ;;  %v1839_v59 = vadd.f32 %v2850_v58, %v1802_v56 }
 0x540   : > { %1880 = vst [vmem:[#allocation2 + $0x50] sm:$0xff] %v3412_v14  ;;  %v3417_v25 = vadd.f32 %v3377_v33, %v1841_v47 }
 0x541   : > { %1878 = vst [vmem:[#allocation2 + $0x40] sm:$0xff] %v1862_v57  ;;  %v1863_v60 = vadd.f32 %v3377_v33, %v1839_v59 }
 0x542   : > { %1881 = vst [vmem:[#allocation2 + $0x58] sm:$0xff] %v3417_v25  ;;  %v1895_v10 = vpack.c.bf16 (!%p2280_p7), %v3417_v25, %v3412_v14 }
 0x543   : > { %1879 = vst [vmem:[#allocation2 + $0x48] sm:$0xff] %v1863_v60  ;;  %v1894_v22 = vpack.c.bf16 (!%p2280_p7), %v1863_v60, %v1862_v57 }
 0x545   : > { %2543 = vmatprep.mubr.bf16.mxu1 (!%p2280_p7), %v1894_v22 }
 0x54b   : > { %v2517_v0 = vpop.f32.mrb[28].mxu1 }
 0x54c   : > { %v1844_v2 = vadd.f32 %v2851_v19, %v2517_v0  ;;  %v1815_v9 = vpop.f32.mrb[29].mxu1 }
 0x54d   : > { %v1842_v13 = vadd.f32 %v2852_v12, %v1815_v9  ;;  %v2518_v51 = vpop.f32.mrb[30].mxu1  ;;  %1889 = sbr.rel (%p2280_p7) target bundleno = 1612 (0x64c), region = 76 }
 0x54e   : > { %v3422_v6 = vadd.f32 %v3377_v33, %v1844_v2  ;;  %v1845_v4 = vadd.f32 %v2853_v3, %v2518_v51  ;;  %v1818_v16 = vpop.f32.mrb[31].mxu1 }
 0x54f   : > { %v1866_v21 = vadd.f32 %v3377_v33, %v1842_v13  ;;  %v1843_v28 = vadd.f32 %v2854_v31, %v1818_v16 }
 0x550   : > { %1884 = vst [vmem:[#allocation2 + $0x70] sm:$0xff] %v3422_v6  ;;  %v1869_v17 = vadd.f32 %v3377_v33, %v1845_v4 }
 0x551   : > { %1882 = vst [vmem:[#allocation2 + $0x60] sm:$0xff] %v1866_v21  ;;  %v1867_v18 = vadd.f32 %v3377_v33, %v1843_v28  ;;  %v2857_v33 = vld [vmem:[%s3508_s10 + $0x10] sm:$0xff] (!%p2280_p7)  }
 0x552   : > { %1885 = vst [vmem:[#allocation2 + $0x78] sm:$0xff] %v1869_v17  ;;  %2523 = vmatprep.subr.bf16.mxu0 (!%p2280_p7), %v2857_v33  ;;  %2569 = vmatprep.subr.bf16.mxu1 (!%p2280_p7), %v2857_v33  ;;  %v1897_v63 = vpack.c.bf16 (!%p2280_p7), %v1869_v17, %v3422_v6 }
 0x553   : > { %1883 = vst [vmem:[#allocation2 + $0x68] sm:$0xff] %v1867_v18  ;;  %2524 = vmatpush3.bf16.msra.mxu0 (!%p2280_p7), %v2857_v33  ;;  %2577 = vmatpush3.bf16.msra.mxu1 (!%p2280_p7), %v2857_v33  ;;  %v1896_v27 = vpack.c.bf16 (!%p2280_p7), %v1867_v18, %v1866_v21 }
 0x554   : > { %2525 = vmatprep.subr.bf16.mxu0 %v2858_v32  ;;  %2570 = vmatprep.subr.bf16.mxu1 %v2858_v32 }
 0x557   : > { %2526 = vmatpush3.bf16.msra.mxu0 %v2858_v32  ;;  %2578 = vmatpush3.bf16.msra.mxu1 %v2858_v32 }
 0x558   : > { %2527 = vmatprep.subr.bf16.mxu0 %v2859_v30  ;;  %2571 = vmatprep.subr.bf16.mxu1 %v2859_v30 }
 0x55b   : > { %2528 = vmatpush3.bf16.msra.mxu0 %v2859_v30  ;;  %2579 = vmatpush3.bf16.msra.mxu1 %v2859_v30 }
 0x55c   : > { %2529 = vmatprep.subr.bf16.mxu0 %v2860_v7  ;;  %2572 = vmatprep.subr.bf16.mxu1 %v2860_v7 }
 0x55f   : > { %2530 = vmatpush3.bf16.msra.mxu0 %v2860_v7  ;;  %2580 = vmatpush3.bf16.msra.mxu1 %v2860_v7 }
 0x560   : > { %2531 = vmatprep.subr.bf16.mxu0 %v2861_v11  ;;  %2573 = vmatprep.subr.bf16.mxu1 %v2861_v11 }
 0x563   : > { %2532 = vmatpush3.bf16.msra.mxu0 %v2861_v11  ;;  %2581 = vmatpush3.bf16.msra.mxu1 %v2861_v11 }
 0x564   : > { %2533 = vmatprep.subr.bf16.mxu0 %v2862_v8  ;;  %2574 = vmatprep.subr.bf16.mxu1 %v2862_v8 }
 0x567   : > { %2534 = vmatpush3.bf16.msra.mxu0 %v2862_v8  ;;  %2582 = vmatpush3.bf16.msra.mxu1 %v2862_v8 }
 0x56a   : > { %2536 = vmatmul.mubr.bf16.vlgmr.msra.gmra.mrb[0].mxu0 %v1891_v26  ;;  %2544 = vmatmul.mubr.bf16.vlgmr.msra.gmra.mrb[0].mxu1 %v1895_v10 }
 0x56b   : > { %2539 = vmatprep.mubr.bf16.mxu0 %v1892_v34  ;;  %2547 = vmatprep.mubr.bf16.mxu1 %v1896_v27 }
 0x572   : > { %2540 = vmatmul.mubr.bf16.gmra.mrb[4].mxu0 %v1893_v23  ;;  %2548 = vmatmul.mubr.bf16.gmra.mrb[4].mxu1 %v1897_v63 }
 0x63d   : > { %v2537_v41 = vpop.f32.mrb[0].mxu0  ;;  %v2545_v42 = vpop.f32.mrb[0].mxu1 }
 0x63e   : > { %v2012_v37 = vadd.f32 %v2537_v41, %v2281_v35  ;;  %v2044_v39 = vadd.f32 %v2545_v42, %v2281_v35  ;;  %v2003_v40 = vpop.f32.mrb[1].mxu0  ;;  %v2035_v29 = vpop.f32.mrb[1].mxu1 }
 0x63f   : > { %v2004_v43 = vadd.f32 %v2281_v35, %v2003_v40  ;;  %v2036_v44 = vadd.f32 %v2281_v35, %v2035_v29  ;;  %v2538_v45 = vpop.f32.mrb[2].mxu0  ;;  %v2546_v1 = vpop.f32.mrb[2].mxu1 }
 0x640   : > { %2068 = vst [vmem:[%s3013_s27 + $0x10] sm:$0xff] %v2012_v37  ;;  %2076 = vst [vmem:[%s3013_s27 + $0x50] sm:$0xff] %v2044_v39  ;;  %v2015_v46 = vadd.f32 %v2538_v45, %v2281_v35  ;;  %v2047_v15 = vadd.f32 %v2546_v1, %v2281_v35  ;;  %v2006_v24 = vpop.f32.mrb[3].mxu0  ;;  %v2038_v48 = vpop.f32.mrb[3].mxu1 }
 0x641   : > { %2066 = vst [vmem:[%s3013_s27] sm:$0xff] %v2004_v43  ;;  %2074 = vst [vmem:[%s3013_s27 + $0x40] sm:$0xff] %v2036_v44  ;;  %v2007_v5 = vadd.f32 %v2281_v35, %v2006_v24  ;;  %v2039_v36 = vadd.f32 %v2281_v35, %v2038_v48 }
 0x642   : > { %2069 = vst [vmem:[%s3013_s27 + $0x18] sm:$0xff] %v2015_v46  ;;  %2077 = vst [vmem:[%s3013_s27 + $0x58] sm:$0xff] %v2047_v15 }
 0x643   : > { %2067 = vst [vmem:[%s3013_s27 + $0x8] sm:$0xff] %v2007_v5  ;;  %2075 = vst [vmem:[%s3013_s27 + $0x48] sm:$0xff] %v2039_v36 }
 0x645   : > { %v2541_v38 = vpop.f32.mrb[4].mxu0  ;;  %v2549_v49 = vpop.f32.mrb[4].mxu1 }
 0x646   : > { %v2028_v62 = vadd.f32 %v2541_v38, %v2281_v35  ;;  %v2060_v50 = vadd.f32 %v2549_v49, %v2281_v35  ;;  %v2019_v53 = vpop.f32.mrb[5].mxu0  ;;  %v2051_v54 = vpop.f32.mrb[5].mxu1 }
 0x647   : > { %v2020_v14 = vadd.f32 %v2281_v35, %v2019_v53  ;;  %v2052_v55 = vadd.f32 %v2281_v35, %v2051_v54  ;;  %v2542_v47 = vpop.f32.mrb[6].mxu0  ;;  %v2550_v56 = vpop.f32.mrb[6].mxu1 }
 0x648   : > { %2072 = vst [vmem:[%s3013_s27 + $0x30] sm:$0xff] %v2028_v62  ;;  %2080 = vst [vmem:[%s3013_s27 + $0x70] sm:$0xff] %v2060_v50  ;;  %v2031_v57 = vadd.f32 %v2542_v47, %v2281_v35  ;;  %v2063_v58 = vadd.f32 %v2550_v56, %v2281_v35  ;;  %v2022_v59 = vpop.f32.mrb[7].mxu0  ;;  %v2054_v25 = vpop.f32.mrb[7].mxu1 }
 0x649   : > { %2070 = vst [vmem:[%s3013_s27 + $0x20] sm:$0xff] %v2020_v14  ;;  %2078 = vst [vmem:[%s3013_s27 + $0x60] sm:$0xff] %v2052_v55  ;;  %v2023_v60 = vadd.f32 %v2281_v35, %v2022_v59  ;;  %v2055_v0 = vadd.f32 %v2281_v35, %v2054_v25 }
 0x64a   : > { %2073 = vst [vmem:[%s3013_s27 + $0x38] sm:$0xff] %v2031_v57  ;;  %2081 = vst [vmem:[%s3013_s27 + $0x78] sm:$0xff] %v2063_v58 }
 0x64b   : > { %2071 = vst [vmem:[%s3013_s27 + $0x28] sm:$0xff] %v2023_v60  ;;  %2079 = vst [vmem:[%s3013_s27 + $0x68] sm:$0xff] %v2055_v0 }
 0x64c PF: > { %s22_s25 = sadd.s32 1, %s2901_s25   ;;  %s3512_s18 = sld [smem:[#allocation4_spill]] }
 0x64d   : > { %p19_p8 = scmp.ge.s32.totalorder %s22_s25, 6   ;;  %s3513_s21 = smov %s2893_s23 }
 0x64e   : > { %s3514_s22 = smov %s2897_s24  ;;  %s3515_s23 = smov %s3518_s26 }
 0x64f   :  { %21 = sbr.rel (!%p19_p8) target bundleno = 3 (0x3), region = 115 }
 0x652   : > { %s3516_s24 = smov %s3512_s18 }

</bundles_post_ra>
